<compile_context>
chip_gen: v7x
topology: tpu7x:2x2x1
jax: 0.10.0
libtpu: 0.0.40
codegen_flags: <defaults>
</compile_context>

<pallas_src>
import functools
import math

import jax
import jax.numpy as jnp
import numpy as np
from jax.experimental import pallas as pl
from jax.experimental.pallas import tpu as pltpu


# ---------------------------------------------------------------------------
# Tile targets.  Sized for a conservative VMEM budget: with bf16 inputs,
# double-buffering and the f32 accumulators, a (256, 512, 512) tile plan uses
# only a few MiB of VMEM, so the same plan fits v5e/v6e (128 MiB) and
# v7x (64 MiB) without touching vmem_limit_bytes.
# ---------------------------------------------------------------------------
_TB = 256   # batch tile (MXU M)
_TK = 512   # reduction tile (K)
_TN = 512   # output lane tile (N) -- large multiple of 128 for unmasked vst


def _pick_tile(dim, target, align):
    """Largest tile <= target that divides `dim` and is a multiple of `align`;
    falls back to the full dim (full-extent blocks are always legal)."""
    if dim <= target:
        return dim
    t = (target // align) * align
    while t >= align:
        if dim % t == 0:
            return t
        t -= align
    return dim


# ---------------------------------------------------------------------------
# Encoder kernel:  f = relu(x @ W1^T + b1_eff),  b1_eff = b1 - b2 @ W1^T
#   grid = (B/tb, S/ts, H/th);  H is the reduction axis (last, "arbitrary").
# ---------------------------------------------------------------------------
def _encoder_kernel(x_ref, w1t_ref, b1_ref, f_ref, acc_ref):
    kh = pl.program_id(2)

    @pl.when(kh == 0)
    def _():
        acc_ref[...] = jnp.zeros_like(acc_ref)

    acc_ref[...] += jnp.dot(x_ref[...], w1t_ref[...],
                            preferred_element_type=jnp.float32)

    @pl.when(kh == pl.num_programs(2) - 1)
    def _():
        # epilogue in f32 vregs (accumulator dtype); cast only at the store
        f_ref[...] = jnp.maximum(acc_ref[...] + b1_ref[...],
                                 0.0).astype(f_ref.dtype)


def encoder(x_bf16, w1t_bf16, b1_eff_2d):
    B, H = x_bf16.shape
    S = w1t_bf16.shape[1]
    tb = _pick_tile(B, _TB, 8)
    th = _pick_tile(H, _TK, 128)
    ts = _pick_tile(S, _TN, 128)
    grid = (B // tb, S // ts, H // th)

    flops = 2 * B * S * H
    bytes_accessed = (B * H * 2 * (S // ts)      # x re-read per output column
                      + H * S * 2 * (B // tb)    # w1t re-read per batch tile
                      + S * 4 + B * S * 4)       # bias + f32 output
    return pl.pallas_call(
        _encoder_kernel,
        out_shape=jax.ShapeDtypeStruct((B, S), jnp.float32),
        grid_spec=pltpu.PrefetchScalarGridSpec(
            num_scalar_prefetch=0,
            grid=grid,
            in_specs=[
                pl.BlockSpec((tb, th), lambda i, j, k: (i, k)),   # x
                pl.BlockSpec((th, ts), lambda i, j, k: (k, j)),   # w1t
                pl.BlockSpec((1, ts), lambda i, j, k: (0, j)),    # b1_eff
            ],
            out_specs=pl.BlockSpec((tb, ts), lambda i, j, k: (i, j)),
            scratch_shapes=[pltpu.VMEM((tb, ts), jnp.float32)],
        ),
        compiler_params=pltpu.CompilerParams(
            dimension_semantics=("parallel", "parallel", "arbitrary")),
        cost_estimate=pl.CostEstimate(flops=flops, transcendentals=0,
                                      bytes_accessed=bytes_accessed),
    )(x_bf16, w1t_bf16, b1_eff_2d)


# ---------------------------------------------------------------------------
# Decoder kernel:  _x = f @ W2^T + b2 ;  dead_x = dead_f @ W2^T + b2
#   grid = (B/tb, H/th, S/ts);  S is the reduction axis (last, "arbitrary").
#   Each w2t tile is DMA'd once and reused for BOTH matmuls.
# ---------------------------------------------------------------------------
def _decoder_kernel(f_ref, df_ref, w2t_ref, b2_ref, x_ref, dx_ref,
                    acc_ref, dacc_ref):
    ks = pl.program_id(2)

    @pl.when(ks == 0)
    def _():
        acc_ref[...] = jnp.zeros_like(acc_ref)
        dacc_ref[...] = jnp.zeros_like(dacc_ref)

    w2t = w2t_ref[...]   # single load, shared by both MXU passes
    acc_ref[...] += jnp.dot(f_ref[...], w2t,
                            preferred_element_type=jnp.float32)
    dacc_ref[...] += jnp.dot(df_ref[...], w2t,
                             preferred_element_type=jnp.float32)

    @pl.when(ks == pl.num_programs(2) - 1)
    def _():
        b2 = b2_ref[...]
        x_ref[...] = (acc_ref[...] + b2).astype(x_ref.dtype)
        dx_ref[...] = (dacc_ref[...] + b2).astype(dx_ref.dtype)


def decoder(f_bf16, dead_f_bf16, w2t_bf16, b2_2d):
    B, S = f_bf16.shape
    H = w2t_bf16.shape[1]
    tb = _pick_tile(B, _TB, 8)
    ts = _pick_tile(S, _TK, 128)
    th = _pick_tile(H, _TN, 128)
    grid = (B // tb, H // th, S // ts)

    flops = 2 * (2 * B * S * H)
    bytes_accessed = (2 * B * S * 2 * (H // th)   # f + dead_f streams
                      + S * H * 2 * (B // tb)     # w2t stream (shared)
                      + H * 4 + 2 * B * H * 4)    # bias + two f32 outputs
    return pl.pallas_call(
        _decoder_kernel,
        out_shape=(jax.ShapeDtypeStruct((B, H), jnp.float32),
                   jax.ShapeDtypeStruct((B, H), jnp.float32)),
        grid_spec=pltpu.PrefetchScalarGridSpec(
            num_scalar_prefetch=0,
            grid=grid,
            in_specs=[
                pl.BlockSpec((tb, ts), lambda i, j, k: (i, k)),   # f
                pl.BlockSpec((tb, ts), lambda i, j, k: (i, k)),   # dead_f
                pl.BlockSpec((ts, th), lambda i, j, k: (k, j)),   # w2t
                pl.BlockSpec((1, th), lambda i, j, k: (0, j)),    # b2
            ],
            out_specs=(pl.BlockSpec((tb, th), lambda i, j, k: (i, j)),
                       pl.BlockSpec((tb, th), lambda i, j, k: (i, j))),
            scratch_shapes=[pltpu.VMEM((tb, th), jnp.float32),
                            pltpu.VMEM((tb, th), jnp.float32)],
        ),
        compiler_params=pltpu.CompilerParams(
            dimension_semantics=("parallel", "parallel", "arbitrary")),
        cost_estimate=pl.CostEstimate(flops=flops, transcendentals=0,
                                      bytes_accessed=bytes_accessed),
    )(f_bf16, dead_f_bf16, w2t_bf16, b2_2d)


# ---------------------------------------------------------------------------
# Full forward (Pallas matmuls + JAX glue for the batch top-k selection)
# ---------------------------------------------------------------------------
def saenet_forward(x, params, dead_features, *, batch_topk, k, dead_k):
    w1t, b1, w2t, b2 = params
    B = x.shape[0]
    S = w1t.shape[1]

    # Fold the (x - sae2.bias) correction into the encoder bias once.
    b1_eff = (b1 - b2 @ w1t).reshape(1, -1).astype(jnp.float32)

    # bf16 MXU operands; accumulation stays f32 inside the kernels.
    x_bf = x.astype(jnp.bfloat16)
    w1t_bf = w1t.astype(jnp.bfloat16)
    w2t_bf = w2t.astype(jnp.bfloat16)

    f = encoder(x_bf, w1t_bf, b1_eff)          # f32 (B, S)
    dead_f = jnp.zeros_like(f)

    if batch_topk:
        f_flat = f.reshape(-1)
        topk_vals, topk_inds = jax.lax.top_k(f_flat, k * B)

        # dead_features.unsqueeze(0).repeat(B, 1).flatten() >= 5
        dead_mask = jnp.tile(dead_features >= 5.0, (B,))
        dead_f_flat = jnp.where(dead_mask, f_flat, 0.0)
        # PyTorch uses topk(min(count_dead, dead_k*B)).  Masked-out entries are
        # exactly 0 (and f >= 0 post-ReLU), so scattering any extra zero-valued
        # picks is a value no-op -> static dead_k*B is value-equivalent.
        dead_topk_vals, dead_topk_inds = jax.lax.top_k(dead_f_flat, dead_k * B)

        f = jnp.zeros_like(f_flat).at[topk_inds].set(topk_vals).reshape(B, S)
        dead_f = (jnp.zeros_like(dead_f_flat)
                  .at[dead_topk_inds].set(dead_topk_vals)
                  .reshape(B, S))

    # TODO(synk): when batch_topk=True, f/dead_f are k-sparse per batch; a
    # gather-based decode (scalar-prefetch of top-k indices) would cut decoder
    # FLOPs/weight traffic by ~S/k.  Kept dense here, but each w2t tile is
    # streamed once and reused for both matmuls inside the kernel.
    _x, dead_x = decoder(f.astype(jnp.bfloat16), dead_f.astype(jnp.bfloat16),
                         w2t_bf, b2.reshape(1, -1).astype(jnp.float32))
    return _x, f, dead_x


# ---------------------------------------------------------------------------
# Pure-JAX reference (same bf16 rounding of MXU operands, f32 math)
# ---------------------------------------------------------------------------
def saenet_reference(x, params, dead_features, *, batch_topk, k, dead_k):
    w1t, b1, w2t, b2 = params
    B, S = x.shape[0], w1t.shape[1]
    xq = x.astype(jnp.bfloat16).astype(jnp.float32)
    w1q = w1t.astype(jnp.bfloat16).astype(jnp.float32)
    w2q = w2t.astype(jnp.bfloat16).astype(jnp.float32)
    b1_eff = b1 - b2 @ w1t

    f = jax.nn.relu(xq @ w1q + b1_eff)
    dead_f = jnp.zeros_like(f)
    if batch_topk:
        f_flat = f.reshape(-1)
        tv, ti = jax.lax.top_k(f_flat, k * B)
        dead_mask = jnp.tile(dead_features >= 5.0, (B,))
        df_flat = jnp.where(dead_mask, f_flat, 0.0)
        dtv, dti = jax.lax.top_k(df_flat, dead_k * B)
        f = jnp.zeros_like(f_flat).at[ti].set(tv).reshape(B, S)
        dead_f = jnp.zeros_like(df_flat).at[dti].set(dtv).reshape(B, S)

    fq = f.astype(jnp.bfloat16).astype(jnp.float32)
    dfq = dead_f.astype(jnp.bfloat16).astype(jnp.float32)
    return fq @ w2q + b2, f, dfq @ w2q + b2


# ---------------------------------------------------------------------------
# Deterministic parameter init (mirrors SAENet.__init__ constraints)
# ---------------------------------------------------------------------------
def init_params(key, hidden_rep_dim, sae_dim):
    # sae2.weight: (hidden_rep_dim, sae_dim), default Linear init bound
    bound = 1.0 / math.sqrt(sae_dim)
    w2 = jax.random.uniform(key, (hidden_rep_dim, sae_dim),
                            minval=-bound, maxval=bound, dtype=jnp.float32)
    w1 = w2.T                                        # sae1.weight <- sae2.weight.T
    b1 = jnp.zeros((sae_dim,), jnp.float32)          # sae1.bias <- 0
    b2 = jnp.zeros((hidden_rep_dim,), jnp.float32)   # sae2.bias <- 0
    # kernels take transposed weights: w1t = w1.T (H,S), w2t = w2.T (S,H)
    return (w1.T, b1, w2.T, b2)


if __name__ == "__main__":
    # small, TPU-friendly shapes implied by the module's run_sae branch
    batch = 32
    hidden_rep_dim = 256
    codebook_size = 1024
    k = 8
    dead_k = 4
    batch_topk = True

    key = jax.random.PRNGKey(0)
    kx, kw = jax.random.split(key)

    params = init_params(kw, hidden_rep_dim, codebook_size)
    # mark a slice of features as "dead" so the dead_f path is exercised
    dead_features = jnp.zeros((codebook_size,), jnp.float32).at[:64].set(6.0)
    x = jax.random.normal(kx, (batch, hidden_rep_dim), dtype=jnp.float32)

    fwd = jax.jit(functools.partial(saenet_forward, batch_topk=batch_topk,
                                    k=k, dead_k=dead_k))
    out_x, out_f, out_dead_x = fwd(x, params, dead_features)
    jax.block_until_ready((out_x, out_f, out_dead_x))

    ref_x, ref_f, ref_dead_x = saenet_reference(
        x, params, dead_features, batch_topk=batch_topk, k=k, dead_k=dead_k)

    # bf16 MXU operands -> compare against the bf16-rounded f32 reference
    np.testing.assert_allclose(np.asarray(out_f), np.asarray(ref_f),
                               rtol=1e-2, atol=1e-3)
    np.testing.assert_allclose(np.asarray(out_x), np.asarray(ref_x),
                               rtol=1e-2, atol=1e-3)
    np.testing.assert_allclose(np.asarray(out_dead_x), np.asarray(ref_dead_x),
                               rtol=1e-2, atol=1e-3)

    print("KERNEL_OK")
</pallas_src>

<mosaic_0001>
module attributes {stable_mosaic.version = 11 : i64} {
  func.func @_encoder_kernel(%arg0: i32, %arg1: i32, %arg2: i32, %arg3: memref<32x256xbf16, #tpu.memory_space<vmem>>, %arg4: memref<256x512xbf16, #tpu.memory_space<vmem>>, %arg5: memref<1x512xf32, #tpu.memory_space<vmem>>, %arg6: memref<32x512xf32, #tpu.memory_space<vmem>>, %arg7: memref<32x512xf32, #tpu.memory_space<vmem>>) attributes {dimension_semantics = [#tpu.dimension_semantics<parallel>, #tpu.dimension_semantics<parallel>, #tpu.dimension_semantics<arbitrary>], iteration_bounds = array<i64: 1, 2, 1>, scalar_prefetch = 0 : i64, scratch_operands = 1 : i64, tpu.core_type = #tpu.core_type<tc>, window_params = [{transform_indices = @transform_0, window_bounds = array<i64: 32, 256>}, {transform_indices = @transform_1, window_bounds = array<i64: 256, 512>}, {transform_indices = @transform_2, window_bounds = array<i64: 1, 512>}, {transform_indices = @transform_3, window_bounds = array<i64: 32, 512>}]} {
    %c0_i32 = arith.constant 0 : i32
    %0 = arith.cmpi eq, %arg2, %c0_i32 : i32
    %1 = arith.extui %0 : i1 to i32
    %c0_i32_0 = arith.constant 0 : i32
    %2 = arith.cmpi ne, %1, %c0_i32_0 : i32
    scf.if %2 {
      %cst_10 = arith.constant 0.000000e+00 : f32
      %12 = vector.broadcast %cst_10 : f32 to vector<32x512xf32>
      %c0_11 = arith.constant 0 : index
      %c0_12 = arith.constant 0 : index
      %13 = vector.load %arg7[%c0_11, %c0_12] : memref<32x512xf32, #tpu.memory_space<vmem>>, vector<32x512xf32>
      tpu.vector_store %arg7[%c0_11, %c0_12], %12 {strides = array<i32>} : memref<32x512xf32, #tpu.memory_space<vmem>>, vector<32x512xf32>,
    } else {
    }
    %c0 = arith.constant 0 : index
    %c0_1 = arith.constant 0 : index
    %3 = vector.load %arg7[%c0, %c0_1] : memref<32x512xf32, #tpu.memory_space<vmem>>, vector<32x512xf32>
    %c0_2 = arith.constant 0 : index
    %c0_3 = arith.constant 0 : index
    %4 = vector.load %arg3[%c0_2, %c0_3] : memref<32x256xbf16, #tpu.memory_space<vmem>>, vector<32x256xbf16>
    %c0_4 = arith.constant 0 : index
    %c0_5 = arith.constant 0 : index
    %5 = vector.load %arg4[%c0_4, %c0_5] : memref<256x512xbf16, #tpu.memory_space<vmem>>, vector<256x512xbf16>
    %cst = arith.constant dense<0.000000e+00> : vector<32x512xf32>
    %6 = tpu.matmul %4, %5, %cst {dimension_numbers = #tpu.dot_dimension_numbers<[1], [0], [0], [1], [0, 0, 1, 1], [], []>} : vector<32x256xbf16>, vector<256x512xbf16>, vector<32x512xf32> -> vector<32x512xf32>
    %7 = arith.addf %3, %6 : vector<32x512xf32>
    %c0_6 = arith.constant 0 : index
    %c0_7 = arith.constant 0 : index
    %8 = vector.load %arg7[%c0_6, %c0_7] : memref<32x512xf32, #tpu.memory_space<vmem>>, vector<32x512xf32>
    tpu.vector_store %arg7[%c0_6, %c0_7], %7 {strides = array<i32>} : memref<32x512xf32, #tpu.memory_space<vmem>>, vector<32x512xf32>,
    %c0_i32_8 = arith.constant 0 : i32
    %9 = arith.cmpi eq, %arg2, %c0_i32_8 : i32
    %10 = arith.extui %9 : i1 to i32
    %c0_i32_9 = arith.constant 0 : i32
    %11 = arith.cmpi ne, %10, %c0_i32_9 : i32
    scf.if %11 {
      %c0_10 = arith.constant 0 : index
      %c0_11 = arith.constant 0 : index
      %12 = vector.load %arg7[%c0_10, %c0_11] : memref<32x512xf32, #tpu.memory_space<vmem>>, vector<32x512xf32>
      %c0_12 = arith.constant 0 : index
      %c0_13 = arith.constant 0 : index
      %13 = vector.load %arg5[%c0_12, %c0_13] : memref<1x512xf32, #tpu.memory_space<vmem>>, vector<1x512xf32>
      %14 = vector.broadcast %13 : vector<1x512xf32> to vector<32x512xf32>
      %15 = arith.addf %12, %14 : vector<32x512xf32>
      %cst_14 = arith.constant 0.000000e+00 : f32
      %16 = vector.broadcast %cst_14 : f32 to vector<32x512xf32>
      %17 = arith.maximumf %15, %16 : vector<32x512xf32>
      %c0_15 = arith.constant 0 : index
      %c0_16 = arith.constant 0 : index
      %18 = vector.load %arg6[%c0_15, %c0_16] : memref<32x512xf32, #tpu.memory_space<vmem>>, vector<32x512xf32>
      tpu.vector_store %arg6[%c0_15, %c0_16], %17 {strides = array<i32>} : memref<32x512xf32, #tpu.memory_space<vmem>>, vector<32x512xf32>,
    } else {
    }
    return
  }
  func.func @transform_0(%arg0: i32, %arg1: i32, %arg2: i32) -> (i32, i32) {
    %c0_i32 = arith.constant 0 : i32
    return %arg0, %arg2 : i32, i32
  }
  func.func @transform_1(%arg0: i32, %arg1: i32, %arg2: i32) -> (i32, i32) {
    %c0_i32 = arith.constant 0 : i32
    return %arg2, %arg1 : i32, i32
  }
  func.func @transform_2(%arg0: i32, %arg1: i32, %arg2: i32) -> (i32, i32) {
    %c0_i32 = arith.constant 0 : i32
    %c0_i32_0 = arith.constant 0 : i32
    return %c0_i32, %arg1 : i32, i32
  }
  func.func @transform_3(%arg0: i32, %arg1: i32, %arg2: i32) -> (i32, i32) {
    %c0_i32 = arith.constant 0 : i32
    return %arg0, %arg1 : i32, i32
  }
}

module attributes {stable_mosaic.version = 11 : i64} {
  func.func @_decoder_kernel(%arg0: i32, %arg1: i32, %arg2: i32, %arg3: memref<32x512xbf16, #tpu.memory_space<vmem>>, %arg4: memref<32x512xbf16, #tpu.memory_space<vmem>>, %arg5: memref<512x256xbf16, #tpu.memory_space<vmem>>, %arg6: memref<1x256xf32, #tpu.memory_space<vmem>>, %arg7: memref<32x256xf32, #tpu.memory_space<vmem>>, %arg8: memref<32x256xf32, #tpu.memory_space<vmem>>, %arg9: memref<32x256xf32, #tpu.memory_space<vmem>>, %arg10: memref<32x256xf32, #tpu.memory_space<vmem>>) attributes {dimension_semantics = [#tpu.dimension_semantics<parallel>, #tpu.dimension_semantics<parallel>, #tpu.dimension_semantics<arbitrary>], iteration_bounds = array<i64: 1, 1, 2>, scalar_prefetch = 0 : i64, scratch_operands = 2 : i64, tpu.core_type = #tpu.core_type<tc>, window_params = [{transform_indices = @transform_0, window_bounds = array<i64: 32, 512>}, {transform_indices = @transform_1, window_bounds = array<i64: 32, 512>}, {transform_indices = @transform_2, window_bounds = array<i64: 512, 256>}, {transform_indices = @transform_3, window_bounds = array<i64: 1, 256>}, {transform_indices = @transform_4, window_bounds = array<i64: 32, 256>}, {transform_indices = @transform_5, window_bounds = array<i64: 32, 256>}]} {
    %c0_i32 = arith.constant 0 : i32
    %0 = arith.cmpi eq, %arg2, %c0_i32 : i32
    %1 = arith.extui %0 : i1 to i32
    %c0_i32_0 = arith.constant 0 : i32
    %2 = arith.cmpi ne, %1, %c0_i32_0 : i32
    scf.if %2 {
      %cst_16 = arith.constant 0.000000e+00 : f32
      %17 = vector.broadcast %cst_16 : f32 to vector<32x256xf32>
      %c0_17 = arith.constant 0 : index
      %c0_18 = arith.constant 0 : index
      %18 = vector.load %arg9[%c0_17, %c0_18] : memref<32x256xf32, #tpu.memory_space<vmem>>, vector<32x256xf32>
      tpu.vector_store %arg9[%c0_17, %c0_18], %17 {strides = array<i32>} : memref<32x256xf32, #tpu.memory_space<vmem>>, vector<32x256xf32>,
      %cst_19 = arith.constant 0.000000e+00 : f32
      %19 = vector.broadcast %cst_19 : f32 to vector<32x256xf32>
      %c0_20 = arith.constant 0 : index
      %c0_21 = arith.constant 0 : index
      %20 = vector.load %arg10[%c0_20, %c0_21] : memref<32x256xf32, #tpu.memory_space<vmem>>, vector<32x256xf32>
      tpu.vector_store %arg10[%c0_20, %c0_21], %19 {strides = array<i32>} : memref<32x256xf32, #tpu.memory_space<vmem>>, vector<32x256xf32>,
    } else {
    }
    %c0 = arith.constant 0 : index
    %c0_1 = arith.constant 0 : index
    %3 = vector.load %arg5[%c0, %c0_1] : memref<512x256xbf16, #tpu.memory_space<vmem>>, vector<512x256xbf16>
    %c0_2 = arith.constant 0 : index
    %c0_3 = arith.constant 0 : index
    %4 = vector.load %arg9[%c0_2, %c0_3] : memref<32x256xf32, #tpu.memory_space<vmem>>, vector<32x256xf32>
    %c0_4 = arith.constant 0 : index
    %c0_5 = arith.constant 0 : index
    %5 = vector.load %arg3[%c0_4, %c0_5] : memref<32x512xbf16, #tpu.memory_space<vmem>>, vector<32x512xbf16>
    %cst = arith.constant dense<0.000000e+00> : vector<32x256xf32>
    %6 = tpu.matmul %5, %3, %cst {dimension_numbers = #tpu.dot_dimension_numbers<[1], [0], [0], [1], [0, 0, 1, 1], [], []>} : vector<32x512xbf16>, vector<512x256xbf16>, vector<32x256xf32> -> vector<32x256xf32>
    %7 = arith.addf %4, %6 : vector<32x256xf32>
    %c0_6 = arith.constant 0 : index
    %c0_7 = arith.constant 0 : index
    %8 = vector.load %arg9[%c0_6, %c0_7] : memref<32x256xf32, #tpu.memory_space<vmem>>, vector<32x256xf32>
    tpu.vector_store %arg9[%c0_6, %c0_7], %7 {strides = array<i32>} : memref<32x256xf32, #tpu.memory_space<vmem>>, vector<32x256xf32>,
    %c0_8 = arith.constant 0 : index
    %c0_9 = arith.constant 0 : index
    %9 = vector.load %arg10[%c0_8, %c0_9] : memref<32x256xf32, #tpu.memory_space<vmem>>, vector<32x256xf32>
    %c0_10 = arith.constant 0 : index
    %c0_11 = arith.constant 0 : index
    %10 = vector.load %arg4[%c0_10, %c0_11] : memref<32x512xbf16, #tpu.memory_space<vmem>>, vector<32x512xbf16>
    %cst_12 = arith.constant dense<0.000000e+00> : vector<32x256xf32>
    %11 = tpu.matmul %10, %3, %cst_12 {dimension_numbers = #tpu.dot_dimension_numbers<[1], [0], [0], [1], [0, 0, 1, 1], [], []>} : vector<32x512xbf16>, vector<512x256xbf16>, vector<32x256xf32> -> vector<32x256xf32>
    %12 = arith.addf %9, %11 : vector<32x256xf32>
    %c0_13 = arith.constant 0 : index
    %c0_14 = arith.constant 0 : index
    %13 = vector.load %arg10[%c0_13, %c0_14] : memref<32x256xf32, #tpu.memory_space<vmem>>, vector<32x256xf32>
    tpu.vector_store %arg10[%c0_13, %c0_14], %12 {strides = array<i32>} : memref<32x256xf32, #tpu.memory_space<vmem>>, vector<32x256xf32>,
    %c1_i32 = arith.constant 1 : i32
    %14 = arith.cmpi eq, %arg2, %c1_i32 : i32
    %15 = arith.extui %14 : i1 to i32
    %c0_i32_15 = arith.constant 0 : i32
    %16 = arith.cmpi ne, %15, %c0_i32_15 : i32
    scf.if %16 {
      %c0_16 = arith.constant 0 : index
      %c0_17 = arith.constant 0 : index
      %17 = vector.load %arg6[%c0_16, %c0_17] : memref<1x256xf32, #tpu.memory_space<vmem>>, vector<1x256xf32>
      %c0_18 = arith.constant 0 : index
      %c0_19 = arith.constant 0 : index
      %18 = vector.load %arg9[%c0_18, %c0_19] : memref<32x256xf32, #tpu.memory_space<vmem>>, vector<32x256xf32>
      %19 = vector.broadcast %17 : vector<1x256xf32> to vector<32x256xf32>
      %20 = arith.addf %18, %19 : vector<32x256xf32>
      %c0_20 = arith.constant 0 : index
      %c0_21 = arith.constant 0 : index
      %21 = vector.load %arg7[%c0_20, %c0_21] : memref<32x256xf32, #tpu.memory_space<vmem>>, vector<32x256xf32>
      tpu.vector_store %arg7[%c0_20, %c0_21], %20 {strides = array<i32>} : memref<32x256xf32, #tpu.memory_space<vmem>>, vector<32x256xf32>,
      %c0_22 = arith.constant 0 : index
      %c0_23 = arith.constant 0 : index
      %22 = vector.load %arg10[%c0_22, %c0_23] : memref<32x256xf32, #tpu.memory_space<vmem>>, vector<32x256xf32>
      %23 = vector.broadcast %17 : vector<1x256xf32> to vector<32x256xf32>
      %24 = arith.addf %22, %23 : vector<32x256xf32>
      %c0_24 = arith.constant 0 : index
      %c0_25 = arith.constant 0 : index
      %25 = vector.load %arg8[%c0_24, %c0_25] : memref<32x256xf32, #tpu.memory_space<vmem>>, vector<32x256xf32>
      tpu.vector_store %arg8[%c0_24, %c0_25], %24 {strides = array<i32>} : memref<32x256xf32, #tpu.memory_space<vmem>>, vector<32x256xf32>,
    } else {
    }
    return
  }
  func.func @transform_0(%arg0: i32, %arg1: i32, %arg2: i32) -> (i32, i32) {
    %c0_i32 = arith.constant 0 : i32
    return %arg0, %arg2 : i32, i32
  }
  func.func @transform_1(%arg0: i32, %arg1: i32, %arg2: i32) -> (i32, i32) {
    %c0_i32 = arith.constant 0 : i32
    return %arg0, %arg2 : i32, i32
  }
  func.func @transform_2(%arg0: i32, %arg1: i32, %arg2: i32) -> (i32, i32) {
    %c0_i32 = arith.constant 0 : i32
    return %arg2, %arg1 : i32, i32
  }
  func.func @transform_3(%arg0: i32, %arg1: i32, %arg2: i32) -> (i32, i32) {
    %c0_i32 = arith.constant 0 : i32
    %c0_i32_0 = arith.constant 0 : i32
    return %c0_i32, %arg1 : i32, i32
  }
  func.func @transform_4(%arg0: i32, %arg1: i32, %arg2: i32) -> (i32, i32) {
    %c0_i32 = arith.constant 0 : i32
    return %arg0, %arg1 : i32, i32
  }
  func.func @transform_5(%arg0: i32, %arg1: i32, %arg2: i32) -> (i32, i32) {
    %c0_i32 = arith.constant 0 : i32
    return %arg0, %arg1 : i32, i32
  }
}

</mosaic_0001>

<bundles_post_ra>
// kernel: sub.1
= control target key start
LH: loop header
LB: loop body
LE: loop exit
PB: predicated region body
PF: predicated region fallthrough
CT: control target
= control target key end

     0   :  { %s34_s0 = inlined_call_operand.vmem [shape: f32[1024], index: 0, kind: input, shape index: {}]   ;;  %s35_s1 = inlined_call_operand.vmem [shape: f32[1024], index: 1, kind: input, shape index: {}]   ;;  %s36_s2 = inlined_call_operand.vmem [shape: f32[1024], index: 2, kind: output, shape index: {}]  }
   0x1   :  { %v3_v0 = vld [vmem:[%s34_s0] sm:$0xff] }
   0x2   :  { %v4_v1 = vld [vmem:[%s35_s1] sm:$0xff] }
   0x3   :  { %v7_v2 = vsub.f32 %v3_v0, %v4_v1 }
   0x5   :  { %9 = vst [vmem:[%s36_s2] sm:$0xff] %v7_v2 }

// kernel: saenet_forward.2
= control target key start
LH: loop header
LB: loop body
LE: loop exit
PB: predicated region body
PF: predicated region fallthrough
CT: control target
= control target key end

     0   :  { %s1525_s12 = smov 0   ;;  %s1527_s13 = smov 0   ;;  %s1849_s0 = inlined_call_operand.vmem [shape: bf16[32,256], index: 0, kind: input, shape index: {}]   ;;  %s1850_s1 = inlined_call_operand.vmem [shape: bf16[256,1024], index: 1, kind: input, shape index: {}]   ;;  %s1851_s2 = inlined_call_operand.vmem [shape: f32[1,1024], index: 2, kind: input, shape index: {}]   ;;  %s1852_s3 = inlined_call_operand.vmem [shape: f32[32,1024], index: 3, kind: output, shape index: {}]  }
   0x1   :  { %s1529_s14 = smov 0   ;;  %s1531_s15 = smov 0  }
   0x2   :  { %s1533_s16 = smov 0  }
   0x3 LB: > { %s28_s17 = sadd.s32 1, %s1499_s15  ;;  %s1236_s18 = sadd.s32 4294967295, %s1503_s16   ;;  %s1503_s16 = sphi %s1533_s16, %s13_s16   ;;  %s1499_s15 = sphi %s1531_s15, %s1857_s15   ;;  %s1495_s14 = sphi %s1529_s14, %s1856_s14   ;;  %s1491_s13 = sphi %s1527_s13, %s1855_s13   ;;  %s1487_s12 = sphi %s1525_s12, %s1854_s12  }
   0x4   : > { %p30_p0 = scmp.ge.s32.totalorder %s28_s17, 2  ;;  %p76_p1 = scmp.ne.s32.totalorder %s1491_s13, %s1487_s12 }
   0x5   : > { %p77_p2 = scmp.eq.s32.totalorder %s1503_s16, 0  ;;  %p134_p4 = scmp.eq.s32.totalorder %s1236_s18, 1 }
   0x6   : > { %s1859_s17 = smov (%p30_p0, %s28_s17), 0  ;;  %s69_s20 = sadd.s32 1, %s1491_s13 }
   0x7   : > { %p78_p3 = por %p77_p2, %p76_p1  ;;  %s65_s19 = ssub.s32 %s1499_s15, %s1859_s17 }
   0x8   : > { %p67_p5 = scmp.eq.s32.totalorder %s65_s19, 0  ;;  %p1560_p6 = por %p134_p4, %p76_p1 }
   0x9   : > { %p1240_p7 = scmp.ge.s32.totalorder %s1503_s16, 2 }
   0xa   : > { %s1565_s22 = scalar_select %p67_p5, %s1491_s13, %s69_s20  }
   0xb   : > { %171 = sbr.rel (%p1240_p7) target bundleno = 54 (0x36), region = 20 }
  0x12   : > { %174 = sbr.rel (!%p78_p3) target bundleno = 54 (0x36), region = 24  ;;  %s176_s23 = sand.u32 (%p78_p3), 1, %s1491_s13  }
  0x13   : > { %s1321_s24 = sshll.u32 (%p78_p3), %s1499_s15, 4  ;;  %s1241_s25 = sshll.u32 (%p78_p3), %s176_s23, 9 }
  0x14   : > { %s1573_s28 = scalar_lea.vmem (%p78_p3), %s1850_s1, %s1321_s24  ;;  %s1578_s29 = scalar_lea.vmem (%p78_p3), [#allocation3], %s1241_s25 }
  0x15   : > { %v197_v0 = vld [vmem:[%s1573_s28] sm:$0xff] (%p78_p3)  ;;  %v199_v1 = vld [vmem:[%s1573_s28 + $0x8] sm:$0xff] (%p78_p3) }
  0x16   : > { %v201_v2 = vld [vmem:[%s1573_s28 + $0x20] sm:$0xff] (%p78_p3)  ;;  %198 = vst [vmem:[%s1578_s29] sm:$0xff] (%p78_p3), %v197_v0  ;;  %200 = vst [vmem:[%s1578_s29 + $0x8] sm:$0xff] (%p78_p3), %v199_v1  ;;  %v203_v3 = vld [vmem:[%s1573_s28 + $0x28] sm:$0xff] (%p78_p3) }
  0x17   : > { %202 = vst [vmem:[%s1578_s29 + $0x10] sm:$0xff] (%p78_p3), %v201_v2  ;;  %v205_v4 = vld [vmem:[%s1573_s28 + $0x40] sm:$0xff] (%p78_p3)  ;;  %v207_v5 = vld [vmem:[%s1573_s28 + $0x48] sm:$0xff] (%p78_p3)  ;;  %204 = vst [vmem:[%s1578_s29 + $0x18] sm:$0xff] (%p78_p3), %v203_v3 }
  0x18   : > { %206 = vst [vmem:[%s1578_s29 + $0x20] sm:$0xff] (%p78_p3), %v205_v4  ;;  %208 = vst [vmem:[%s1578_s29 + $0x28] sm:$0xff] (%p78_p3), %v207_v5  ;;  %v209_v6 = vld [vmem:[%s1573_s28 + $0x60] sm:$0xff] (%p78_p3)  ;;  %v211_v7 = vld [vmem:[%s1573_s28 + $0x68] sm:$0xff] (%p78_p3) }
  0x19   : > { %v213_v8 = vld [vmem:[%s1573_s28 + $0x80] sm:$0xff]  ;;  %210 = vst [vmem:[%s1578_s29 + $0x30] sm:$0xff] %v209_v6  ;;  %212 = vst [vmem:[%s1578_s29 + $0x38] sm:$0xff] %v211_v7  ;;  %v215_v9 = vld [vmem:[%s1573_s28 + $0x88] sm:$0xff] }
  0x1a   : > { %214 = vst [vmem:[%s1578_s29 + $0x40] sm:$0xff] %v213_v8  ;;  %v217_v10 = vld [vmem:[%s1573_s28 + $0xa0] sm:$0xff]  ;;  %v219_v11 = vld [vmem:[%s1573_s28 + $0xa8] sm:$0xff]  ;;  %216 = vst [vmem:[%s1578_s29 + $0x48] sm:$0xff] %v215_v9 }
  0x1b   : > { %218 = vst [vmem:[%s1578_s29 + $0x50] sm:$0xff] %v217_v10  ;;  %220 = vst [vmem:[%s1578_s29 + $0x58] sm:$0xff] %v219_v11  ;;  %v221_v12 = vld [vmem:[%s1573_s28 + $0xc0] sm:$0xff]  ;;  %v223_v13 = vld [vmem:[%s1573_s28 + $0xc8] sm:$0xff] }
  0x1c   : > { %v225_v14 = vld [vmem:[%s1573_s28 + $0xe0] sm:$0xff]  ;;  %222 = vst [vmem:[%s1578_s29 + $0x60] sm:$0xff] %v221_v12  ;;  %224 = vst [vmem:[%s1578_s29 + $0x68] sm:$0xff] %v223_v13  ;;  %v227_v15 = vld [vmem:[%s1573_s28 + $0xe8] sm:$0xff] }
  0x1d   : > { %226 = vst [vmem:[%s1578_s29 + $0x70] sm:$0xff] %v225_v14  ;;  %v229_v16 = vld [vmem:[%s1573_s28 + $0x100] sm:$0xff]  ;;  %v231_v17 = vld [vmem:[%s1573_s28 + $0x108] sm:$0xff]  ;;  %228 = vst [vmem:[%s1578_s29 + $0x78] sm:$0xff] %v227_v15 }
  0x1e   : > { %230 = vst [vmem:[%s1578_s29 + $0x80] sm:$0xff] %v229_v16  ;;  %232 = vst [vmem:[%s1578_s29 + $0x88] sm:$0xff] %v231_v17  ;;  %v233_v18 = vld [vmem:[%s1573_s28 + $0x120] sm:$0xff]  ;;  %v235_v19 = vld [vmem:[%s1573_s28 + $0x128] sm:$0xff] }
  0x1f   : > { %v237_v20 = vld [vmem:[%s1573_s28 + $0x140] sm:$0xff]  ;;  %234 = vst [vmem:[%s1578_s29 + $0x90] sm:$0xff] %v233_v18  ;;  %236 = vst [vmem:[%s1578_s29 + $0x98] sm:$0xff] %v235_v19  ;;  %v239_v21 = vld [vmem:[%s1573_s28 + $0x148] sm:$0xff] }
  0x20   : > { %238 = vst [vmem:[%s1578_s29 + $0xa0] sm:$0xff] %v237_v20  ;;  %v241_v22 = vld [vmem:[%s1573_s28 + $0x160] sm:$0xff]  ;;  %v243_v23 = vld [vmem:[%s1573_s28 + $0x168] sm:$0xff]  ;;  %240 = vst [vmem:[%s1578_s29 + $0xa8] sm:$0xff] %v239_v21 }
  0x21   : > { %242 = vst [vmem:[%s1578_s29 + $0xb0] sm:$0xff] %v241_v22  ;;  %244 = vst [vmem:[%s1578_s29 + $0xb8] sm:$0xff] %v243_v23  ;;  %v245_v24 = vld [vmem:[%s1573_s28 + $0x180] sm:$0xff]  ;;  %v247_v25 = vld [vmem:[%s1573_s28 + $0x188] sm:$0xff] }
  0x22   : > { %v249_v26 = vld [vmem:[%s1573_s28 + $0x1a0] sm:$0xff]  ;;  %246 = vst [vmem:[%s1578_s29 + $0xc0] sm:$0xff] %v245_v24  ;;  %248 = vst [vmem:[%s1578_s29 + $0xc8] sm:$0xff] %v247_v25  ;;  %v251_v27 = vld [vmem:[%s1573_s28 + $0x1a8] sm:$0xff] }
  0x23   : > { %250 = vst [vmem:[%s1578_s29 + $0xd0] sm:$0xff] %v249_v26  ;;  %v253_v28 = vld [vmem:[%s1573_s28 + $0x1c0] sm:$0xff]  ;;  %v255_v29 = vld [vmem:[%s1573_s28 + $0x1c8] sm:$0xff]  ;;  %252 = vst [vmem:[%s1578_s29 + $0xd8] sm:$0xff] %v251_v27 }
  0x24   : > { %254 = vst [vmem:[%s1578_s29 + $0xe0] sm:$0xff] %v253_v28  ;;  %256 = vst [vmem:[%s1578_s29 + $0xe8] sm:$0xff] %v255_v29  ;;  %v257_v30 = vld [vmem:[%s1573_s28 + $0x1e0] sm:$0xff]  ;;  %v259_v31 = vld [vmem:[%s1573_s28 + $0x1e8] sm:$0xff] }
  0x25   : > { %v261_v32 = vld [vmem:[%s1573_s28 + $0x200] sm:$0xff]  ;;  %258 = vst [vmem:[%s1578_s29 + $0xf0] sm:$0xff] %v257_v30  ;;  %260 = vst [vmem:[%s1578_s29 + $0xf8] sm:$0xff] %v259_v31  ;;  %v263_v33 = vld [vmem:[%s1573_s28 + $0x208] sm:$0xff] }
  0x26   : > { %262 = vst [vmem:[%s1578_s29 + $0x100] sm:$0xff] %v261_v32  ;;  %v265_v34 = vld [vmem:[%s1573_s28 + $0x220] sm:$0xff]  ;;  %v267_v35 = vld [vmem:[%s1573_s28 + $0x228] sm:$0xff]  ;;  %264 = vst [vmem:[%s1578_s29 + $0x108] sm:$0xff] %v263_v33 }
  0x27   : > { %266 = vst [vmem:[%s1578_s29 + $0x110] sm:$0xff] %v265_v34  ;;  %268 = vst [vmem:[%s1578_s29 + $0x118] sm:$0xff] %v267_v35  ;;  %v269_v36 = vld [vmem:[%s1573_s28 + $0x240] sm:$0xff]  ;;  %v271_v37 = vld [vmem:[%s1573_s28 + $0x248] sm:$0xff] }
  0x28   : > { %v273_v38 = vld [vmem:[%s1573_s28 + $0x260] sm:$0xff]  ;;  %270 = vst [vmem:[%s1578_s29 + $0x120] sm:$0xff] %v269_v36  ;;  %272 = vst [vmem:[%s1578_s29 + $0x128] sm:$0xff] %v271_v37  ;;  %v275_v39 = vld [vmem:[%s1573_s28 + $0x268] sm:$0xff] }
  0x29   : > { %274 = vst [vmem:[%s1578_s29 + $0x130] sm:$0xff] %v273_v38  ;;  %v277_v40 = vld [vmem:[%s1573_s28 + $0x280] sm:$0xff]  ;;  %v279_v41 = vld [vmem:[%s1573_s28 + $0x288] sm:$0xff]  ;;  %276 = vst [vmem:[%s1578_s29 + $0x138] sm:$0xff] %v275_v39 }
  0x2a   : > { %278 = vst [vmem:[%s1578_s29 + $0x140] sm:$0xff] %v277_v40  ;;  %280 = vst [vmem:[%s1578_s29 + $0x148] sm:$0xff] %v279_v41  ;;  %v281_v42 = vld [vmem:[%s1573_s28 + $0x2a0] sm:$0xff]  ;;  %v283_v43 = vld [vmem:[%s1573_s28 + $0x2a8] sm:$0xff] }
  0x2b   : > { %v285_v44 = vld [vmem:[%s1573_s28 + $0x2c0] sm:$0xff]  ;;  %282 = vst [vmem:[%s1578_s29 + $0x150] sm:$0xff] %v281_v42  ;;  %284 = vst [vmem:[%s1578_s29 + $0x158] sm:$0xff] %v283_v43  ;;  %v287_v45 = vld [vmem:[%s1573_s28 + $0x2c8] sm:$0xff] }
  0x2c   : > { %286 = vst [vmem:[%s1578_s29 + $0x160] sm:$0xff] %v285_v44  ;;  %v289_v46 = vld [vmem:[%s1573_s28 + $0x2e0] sm:$0xff]  ;;  %v291_v47 = vld [vmem:[%s1573_s28 + $0x2e8] sm:$0xff]  ;;  %288 = vst [vmem:[%s1578_s29 + $0x168] sm:$0xff] %v287_v45 }
  0x2d   : > { %290 = vst [vmem:[%s1578_s29 + $0x170] sm:$0xff] %v289_v46  ;;  %292 = vst [vmem:[%s1578_s29 + $0x178] sm:$0xff] %v291_v47  ;;  %v293_v48 = vld [vmem:[%s1573_s28 + $0x300] sm:$0xff]  ;;  %v295_v49 = vld [vmem:[%s1573_s28 + $0x308] sm:$0xff] }
  0x2e   : > { %v297_v50 = vld [vmem:[%s1573_s28 + $0x320] sm:$0xff]  ;;  %294 = vst [vmem:[%s1578_s29 + $0x180] sm:$0xff] %v293_v48  ;;  %296 = vst [vmem:[%s1578_s29 + $0x188] sm:$0xff] %v295_v49  ;;  %v299_v51 = vld [vmem:[%s1573_s28 + $0x328] sm:$0xff] }
  0x2f   : > { %298 = vst [vmem:[%s1578_s29 + $0x190] sm:$0xff] %v297_v50  ;;  %v301_v52 = vld [vmem:[%s1573_s28 + $0x340] sm:$0xff]  ;;  %v303_v53 = vld [vmem:[%s1573_s28 + $0x348] sm:$0xff]  ;;  %300 = vst [vmem:[%s1578_s29 + $0x198] sm:$0xff] %v299_v51 }
  0x30   : > { %302 = vst [vmem:[%s1578_s29 + $0x1a0] sm:$0xff] %v301_v52  ;;  %304 = vst [vmem:[%s1578_s29 + $0x1a8] sm:$0xff] %v303_v53  ;;  %v305_v54 = vld [vmem:[%s1573_s28 + $0x360] sm:$0xff]  ;;  %v307_v55 = vld [vmem:[%s1573_s28 + $0x368] sm:$0xff] }
  0x31   : > { %v309_v56 = vld [vmem:[%s1573_s28 + $0x380] sm:$0xff]  ;;  %306 = vst [vmem:[%s1578_s29 + $0x1b0] sm:$0xff] %v305_v54  ;;  %308 = vst [vmem:[%s1578_s29 + $0x1b8] sm:$0xff] %v307_v55  ;;  %v311_v57 = vld [vmem:[%s1573_s28 + $0x388] sm:$0xff] }
  0x32   : > { %310 = vst [vmem:[%s1578_s29 + $0x1c0] sm:$0xff] %v309_v56  ;;  %v313_v58 = vld [vmem:[%s1573_s28 + $0x3a0] sm:$0xff]  ;;  %v315_v59 = vld [vmem:[%s1573_s28 + $0x3a8] sm:$0xff]  ;;  %312 = vst [vmem:[%s1578_s29 + $0x1c8] sm:$0xff] %v311_v57 }
  0x33   : > { %314 = vst [vmem:[%s1578_s29 + $0x1d0] sm:$0xff] %v313_v58  ;;  %316 = vst [vmem:[%s1578_s29 + $0x1d8] sm:$0xff] %v315_v59  ;;  %v317_v60 = vld [vmem:[%s1573_s28 + $0x3c0] sm:$0xff]  ;;  %v319_v61 = vld [vmem:[%s1573_s28 + $0x3c8] sm:$0xff] }
  0x34   : > { %v321_v62 = vld [vmem:[%s1573_s28 + $0x3e0] sm:$0xff]  ;;  %318 = vst [vmem:[%s1578_s29 + $0x1e0] sm:$0xff] %v317_v60  ;;  %320 = vst [vmem:[%s1578_s29 + $0x1e8] sm:$0xff] %v319_v61  ;;  %v323_v63 = vld [vmem:[%s1573_s28 + $0x3e8] sm:$0xff] }
  0x35   : > { %322 = vst [vmem:[%s1578_s29 + $0x1f0] sm:$0xff] %v321_v62  ;;  %324 = vst [vmem:[%s1578_s29 + $0x1f8] sm:$0xff] %v323_v63 }
  0x36 PF: > { %p1244_p8 = scmp.ge.s32.totalorder %s1503_s16, 1  ;;  %p337_p9 = scmp.lt.s32.totalorder %s1503_s16, 3 }
  0x38   : > { %p338_p10 = pnand %p1244_p8, %p337_p9 }
  0x39   : > { %s344_s30 = sand.u32 (!%p338_p10), 1, %s1487_s12   ;;  %v1461_v0 = vld [vmem:[%s1849_s0 + $0x4] ss:$8 sps:$4 sm:$0xff] (!%p338_p10)   ;;  %s1247_s20 = sshll.u32 (!%p338_p10), %s1495_s14, 2 }
  0x3a   : > { %341 = sbr.rel (%p338_p10) target bundleno = 361 (0x169), region = 51  ;;  %s1245_s4 = sshll.u32 (!%p338_p10), %s344_s30, 9  ;;  %877 = vmatprep.mubr.bf16.mxu0 (!%p338_p10), %v1461_v0  ;;  %930 = vmatprep.mubr.bf16.mxu1 (!%p338_p10), %v1461_v0 }
  0x3b   : > { %s1713_s7 = scalar_lea.vmem (!%p338_p10), [#allocation3], %s1245_s4  ;;  %p395_p11 = scmp.lt.s32.totalorder (!%p338_p10), %s1247_s20, 7 }
  0x3c   : > { %v1363_v1 = vld [vmem:[%s1713_s7 + $0x4] ss:$16 sps:$4 sm:$0xff] (!%p338_p10)   ;;  %v1365_v2 = vld [vmem:[%s1713_s7 + $0xc] ss:$16 sps:$4 sm:$0xff] (!%p338_p10)   ;;  %v1367_v3 = vld [vmem:[%s1713_s7] ss:$16 sps:$4 sm:$0xff] (!%p338_p10)  }
  0x3d   : > { %845 = vmatprep.subr.bf16.mxu0 (!%p338_p10), %v1363_v1  ;;  %v1368_v4 = vld [vmem:[%s1713_s7 + $0x8] ss:$16 sps:$4 sm:$0xff] (!%p338_p10)   ;;  %898 = vmatprep.subr.bf16.mxu1 (!%p338_p10), %v1365_v2  ;;  %v1369_v5 = vld [vmem:[%s1713_s7 + $0x24] ss:$16 sps:$4 sm:$0xff] (!%p338_p10)   ;;  %v1371_v6 = vld [vmem:[%s1713_s7 + $0x2c] ss:$16 sps:$4 sm:$0xff] (!%p338_p10)  }
  0x3e   : > { %846 = vmatpush1.bf16.msra.mxu0 (!%p338_p10), %v1367_v3  ;;  %899 = vmatpush1.bf16.msra.mxu1 (!%p338_p10), %v1368_v4  ;;  %v1373_v7 = vld [vmem:[%s1713_s7 + $0x20] ss:$16 sps:$4 sm:$0xff] (!%p338_p10)   ;;  %v1374_v8 = vld [vmem:[%s1713_s7 + $0x28] ss:$16 sps:$4 sm:$0xff] (!%p338_p10)   ;;  %v1375_v9 = vld [vmem:[%s1713_s7 + $0x44] ss:$16 sps:$4 sm:$0xff] (!%p338_p10)   ;;  %v1004_v4 = vlaneseq (!%p338_p10) }
  0x3f   : > { %847 = vmatprep.subr.bf16.mxu0 (!%p338_p10), %v1369_v5  ;;  %900 = vmatprep.subr.bf16.mxu1 (!%p338_p10), %v1371_v6  ;;  %v1377_v10 = vld [vmem:[%s1713_s7 + $0x4c] ss:$16 sps:$4 sm:$0xff] (!%p338_p10)   ;;  %v1379_v11 = vld [vmem:[%s1713_s7 + $0x40] ss:$16 sps:$4 sm:$0xff] (!%p338_p10)   ;;  %v1380_v12 = vld [vmem:[%s1713_s7 + $0x48] ss:$16 sps:$4 sm:$0xff] (!%p338_p10)  }
  0x40   : > { %v1381_v13 = vld [vmem:[%s1713_s7 + $0x64] ss:$16 sps:$4 sm:$0xff] (!%p338_p10)   ;;  %v1383_v14 = vld [vmem:[%s1713_s7 + $0x6c] ss:$16 sps:$4 sm:$0xff] (!%p338_p10)   ;;  %v1385_v15 = vld [vmem:[%s1713_s7 + $0x60] ss:$16 sps:$4 sm:$0xff] (!%p338_p10)  }
  0x41   : > { %v1386_v16 = vld [vmem:[%s1713_s7 + $0x68] ss:$16 sps:$4 sm:$0xff]   ;;  %v1387_v17 = vld [vmem:[%s1713_s7 + $0x84] ss:$16 sps:$4 sm:$0xff]   ;;  %v1389_v18 = vld [vmem:[%s1713_s7 + $0x8c] ss:$16 sps:$4 sm:$0xff]  }
  0x42   : > { %848 = vmatpush1.bf16.msra.mxu0 %v1373_v7  ;;  %901 = vmatpush1.bf16.msra.mxu1 %v1374_v8  ;;  %v1391_v19 = vld [vmem:[%s1713_s7 + $0x80] ss:$16 sps:$4 sm:$0xff]   ;;  %v1392_v20 = vld [vmem:[%s1713_s7 + $0x88] ss:$16 sps:$4 sm:$0xff]   ;;  %v1393_v21 = vld [vmem:[%s1713_s7 + $0xa4] ss:$16 sps:$4 sm:$0xff]  }
  0x43   : > { %849 = vmatprep.subr.bf16.mxu0 %v1375_v9  ;;  %902 = vmatprep.subr.bf16.mxu1 %v1377_v10  ;;  %v1395_v22 = vld [vmem:[%s1713_s7 + $0xac] ss:$16 sps:$4 sm:$0xff]   ;;  %v1397_v23 = vld [vmem:[%s1713_s7 + $0xa0] ss:$16 sps:$4 sm:$0xff]   ;;  %v1398_v24 = vld [vmem:[%s1713_s7 + $0xa8] ss:$16 sps:$4 sm:$0xff]  }
  0x44   : > { %v1399_v25 = vld [vmem:[%s1713_s7 + $0xc4] ss:$16 sps:$4 sm:$0xff]   ;;  %v1401_v26 = vld [vmem:[%s1713_s7 + $0xcc] ss:$16 sps:$4 sm:$0xff]   ;;  %v1403_v27 = vld [vmem:[%s1713_s7 + $0xc0] ss:$16 sps:$4 sm:$0xff]  }
  0x45   : > { %v1404_v28 = vld [vmem:[%s1713_s7 + $0xc8] ss:$16 sps:$4 sm:$0xff]   ;;  %v1405_v29 = vld [vmem:[%s1713_s7 + $0xe4] ss:$16 sps:$4 sm:$0xff]   ;;  %v1407_v30 = vld [vmem:[%s1713_s7 + $0xec] ss:$16 sps:$4 sm:$0xff]  }
  0x46   : > { %850 = vmatpush1.bf16.msra.mxu0 %v1379_v11  ;;  %903 = vmatpush1.bf16.msra.mxu1 %v1380_v12  ;;  %v1409_v31 = vld [vmem:[%s1713_s7 + $0xe0] ss:$16 sps:$4 sm:$0xff]   ;;  %v1410_v32 = vld [vmem:[%s1713_s7 + $0xe8] ss:$16 sps:$4 sm:$0xff]   ;;  %v1411_v33 = vld [vmem:[%s1713_s7 + $0x104] ss:$16 sps:$4 sm:$0xff]  }
  0x47   : > { %851 = vmatprep.subr.bf16.mxu0 %v1381_v13  ;;  %904 = vmatprep.subr.bf16.mxu1 %v1383_v14  ;;  %v1413_v34 = vld [vmem:[%s1713_s7 + $0x10c] ss:$16 sps:$4 sm:$0xff]   ;;  %v1415_v35 = vld [vmem:[%s1713_s7 + $0x100] ss:$16 sps:$4 sm:$0xff]   ;;  %v1416_v36 = vld [vmem:[%s1713_s7 + $0x108] ss:$16 sps:$4 sm:$0xff]  }
  0x48   : > { %v1417_v37 = vld [vmem:[%s1713_s7 + $0x124] ss:$16 sps:$4 sm:$0xff]   ;;  %v1419_v38 = vld [vmem:[%s1713_s7 + $0x12c] ss:$16 sps:$4 sm:$0xff]   ;;  %v1421_v39 = vld [vmem:[%s1713_s7 + $0x120] ss:$16 sps:$4 sm:$0xff]  }
  0x49   : > { %v1422_v40 = vld [vmem:[%s1713_s7 + $0x128] ss:$16 sps:$4 sm:$0xff]   ;;  %v1423_v41 = vld [vmem:[%s1713_s7 + $0x144] ss:$16 sps:$4 sm:$0xff]   ;;  %v1425_v42 = vld [vmem:[%s1713_s7 + $0x14c] ss:$16 sps:$4 sm:$0xff]  }
  0x4a   : > { %852 = vmatpush1.bf16.msra.mxu0 %v1385_v15  ;;  %905 = vmatpush1.bf16.msra.mxu1 %v1386_v16  ;;  %v1427_v43 = vld [vmem:[%s1713_s7 + $0x140] ss:$16 sps:$4 sm:$0xff]   ;;  %v1428_v44 = vld [vmem:[%s1713_s7 + $0x148] ss:$16 sps:$4 sm:$0xff]   ;;  %v1429_v45 = vld [vmem:[%s1713_s7 + $0x164] ss:$16 sps:$4 sm:$0xff]  }
  0x4b   : > { %853 = vmatprep.subr.bf16.mxu0 %v1387_v17  ;;  %906 = vmatprep.subr.bf16.mxu1 %v1389_v18  ;;  %v1431_v46 = vld [vmem:[%s1713_s7 + $0x16c] ss:$16 sps:$4 sm:$0xff]   ;;  %v1433_v47 = vld [vmem:[%s1713_s7 + $0x160] ss:$16 sps:$4 sm:$0xff]   ;;  %v1434_v48 = vld [vmem:[%s1713_s7 + $0x168] ss:$16 sps:$4 sm:$0xff]  }
  0x4c   : > { %v1435_v49 = vld [vmem:[%s1713_s7 + $0x184] ss:$16 sps:$4 sm:$0xff]   ;;  %v1437_v50 = vld [vmem:[%s1713_s7 + $0x18c] ss:$16 sps:$4 sm:$0xff]   ;;  %v1439_v51 = vld [vmem:[%s1713_s7 + $0x180] ss:$16 sps:$4 sm:$0xff]  }
  0x4d   : > { %v1440_v52 = vld [vmem:[%s1713_s7 + $0x188] ss:$16 sps:$4 sm:$0xff]   ;;  %v1441_v53 = vld [vmem:[%s1713_s7 + $0x1a4] ss:$16 sps:$4 sm:$0xff]   ;;  %v1443_v54 = vld [vmem:[%s1713_s7 + $0x1ac] ss:$16 sps:$4 sm:$0xff]  }
  0x4e   : > { %854 = vmatpush1.bf16.msra.mxu0 %v1391_v19  ;;  %907 = vmatpush1.bf16.msra.mxu1 %v1392_v20  ;;  %v1445_v55 = vld [vmem:[%s1713_s7 + $0x1a0] ss:$16 sps:$4 sm:$0xff]   ;;  %v1446_v56 = vld [vmem:[%s1713_s7 + $0x1a8] ss:$16 sps:$4 sm:$0xff]   ;;  %v1447_v57 = vld [vmem:[%s1713_s7 + $0x1c4] ss:$16 sps:$4 sm:$0xff]  }
  0x4f   : > { %855 = vmatprep.subr.bf16.mxu0 %v1393_v21  ;;  %908 = vmatprep.subr.bf16.mxu1 %v1395_v22  ;;  %v1449_v58 = vld [vmem:[%s1713_s7 + $0x1cc] ss:$16 sps:$4 sm:$0xff]   ;;  %v1451_v59 = vld [vmem:[%s1713_s7 + $0x1c0] ss:$16 sps:$4 sm:$0xff]   ;;  %v1452_v60 = vld [vmem:[%s1713_s7 + $0x1c8] ss:$16 sps:$4 sm:$0xff]  }
  0x50   : > { %v1453_v61 = vld [vmem:[%s1713_s7 + $0x1e4] ss:$16 sps:$4 sm:$0xff]   ;;  %v1455_v62 = vld [vmem:[%s1713_s7 + $0x1ec] ss:$16 sps:$4 sm:$0xff]   ;;  %v1457_v63 = vld [vmem:[%s1713_s7 + $0x1e0] ss:$16 sps:$4 sm:$0xff]  }
  0x51   : > { %v1458_v0 = vld [vmem:[%s1713_s7 + $0x1e8] ss:$16 sps:$4 sm:$0xff]   ;;  %v1462_v2 = vld [vmem:[%s1849_s0 + $0x14] ss:$8 sps:$4 sm:$0xff]   ;;  %s1861_s20 = smov (!%p395_p11, %s1247_s20), 7  ;;  %v1005_v5 = vshrl.u32 %v1004_v4, 7 }
  0x52   : > { %856 = vmatpush1.bf16.msra.mxu0 %v1397_v23  ;;  %909 = vmatpush1.bf16.msra.mxu1 %v1398_v24  ;;  %v1459_v1 = vld [vmem:[%s1849_s0] ss:$8 sps:$4 sm:$0xff]   ;;  %v1464_v3 = vld [vmem:[%s1849_s0 + $0x10] ss:$8 sps:$4 sm:$0xff]   ;;  %s397_s25 = scalar_lea.vmem %s1851_s2, %s1861_s20  ;;  %s1246_s26 = sshll.u32 %s344_s30, 7 }
  0x53   : > { %857 = vmatprep.subr.bf16.mxu0 %v1399_v25  ;;  %910 = vmatprep.subr.bf16.mxu1 %v1401_v26  ;;  %v1006_v6 = vsub.s32 0, %v1005_v5  ;;  %v1014_v7 = vsub.s32 2, %v1005_v5  ;;  %v1002_v8 = vld [vmem:[%s397_s25] sm:$0xf]  ;;  %v1010_v9 = vsub.s32 1, %v1005_v5  ;;  %v1018_v10 = vsub.s32 3, %v1005_v5 }
  0x54   : > { %s1794_s12 = scalar_lea.vmem [#allocation4], %s1246_s26  ;;  %s1322_s27 = sshll.u32 (%p1560_p6), %s1495_s14, 5 }
  0x55   : > { %v1007_v11 = vrot.slane %v1002_v8, %v1006_v6  ;;  %v1015_v12 = vrot.slane %v1002_v8, %v1014_v7  ;;  %v1011_v13 = vrot.slane %v1002_v8, %v1010_v9  ;;  %v1019_v14 = vrot.slane %v1002_v8, %v1018_v10  ;;  %s1084_s30 = scalar_lea.vmem (%p1560_p6), %s1852_s3, %s1322_s27 }
  0x56   : > { %858 = vmatpush1.bf16.msra.mxu0 %v1403_v27  ;;  %911 = vmatpush1.bf16.msra.mxu1 %v1404_v28 }
  0x57   : > { %859 = vmatprep.subr.bf16.mxu0 %v1405_v29  ;;  %912 = vmatprep.subr.bf16.mxu1 %v1407_v30 }
  0x5a   : > { %860 = vmatpush1.bf16.msra.mxu0 %v1409_v31  ;;  %913 = vmatpush1.bf16.msra.mxu1 %v1410_v32 }
  0x5b   : > { %861 = vmatprep.subr.bf16.mxu0 %v1411_v33  ;;  %914 = vmatprep.subr.bf16.mxu1 %v1413_v34 }
  0x5e   : > { %862 = vmatpush1.bf16.msra.mxu0 %v1415_v35  ;;  %915 = vmatpush1.bf16.msra.mxu1 %v1416_v36 }
  0x5f   : > { %863 = vmatprep.subr.bf16.mxu0 %v1417_v37  ;;  %916 = vmatprep.subr.bf16.mxu1 %v1419_v38 }
  0x62   : > { %864 = vmatpush1.bf16.msra.mxu0 %v1421_v39  ;;  %917 = vmatpush1.bf16.msra.mxu1 %v1422_v40 }
  0x63   : > { %865 = vmatprep.subr.bf16.mxu0 %v1423_v41  ;;  %918 = vmatprep.subr.bf16.mxu1 %v1425_v42 }
  0x66   : > { %866 = vmatpush1.bf16.msra.mxu0 %v1427_v43  ;;  %919 = vmatpush1.bf16.msra.mxu1 %v1428_v44 }
  0x67   : > { %867 = vmatprep.subr.bf16.mxu0 %v1429_v45  ;;  %920 = vmatprep.subr.bf16.mxu1 %v1431_v46 }
  0x6a   : > { %868 = vmatpush1.bf16.msra.mxu0 %v1433_v47  ;;  %921 = vmatpush1.bf16.msra.mxu1 %v1434_v48 }
  0x6b   : > { %869 = vmatprep.subr.bf16.mxu0 %v1435_v49  ;;  %922 = vmatprep.subr.bf16.mxu1 %v1437_v50 }
  0x6e   : > { %870 = vmatpush1.bf16.msra.mxu0 %v1439_v51  ;;  %923 = vmatpush1.bf16.msra.mxu1 %v1440_v52 }
  0x6f   : > { %871 = vmatprep.subr.bf16.mxu0 %v1441_v53  ;;  %924 = vmatprep.subr.bf16.mxu1 %v1443_v54 }
  0x72   : > { %872 = vmatpush1.bf16.msra.mxu0 %v1445_v55  ;;  %925 = vmatpush1.bf16.msra.mxu1 %v1446_v56 }
  0x73   : > { %873 = vmatprep.subr.bf16.mxu0 %v1447_v57  ;;  %926 = vmatprep.subr.bf16.mxu1 %v1449_v58 }
  0x76   : > { %874 = vmatpush1.bf16.msra.mxu0 %v1451_v59  ;;  %927 = vmatpush1.bf16.msra.mxu1 %v1452_v60 }
  0x77   : > { %875 = vmatprep.subr.bf16.mxu0 %v1453_v61  ;;  %928 = vmatprep.subr.bf16.mxu1 %v1455_v62 }
  0x7a   : > { %876 = vmatpush1.bf16.msra.mxu0 %v1457_v63  ;;  %929 = vmatpush1.bf16.msra.mxu1 %v1458_v0 }
  0x7d   : > { %878 = vmatmul.mubr.bf16.vlgmr.msra.gmra.mrb[0].mxu0 %v1459_v1  ;;  %931 = vmatmul.mubr.bf16.vlgmr.msra.gmra.mrb[0].mxu1 %v1459_v1 }
  0x7e   : > { %887 = vmatprep.mubr.bf16.mxu0 %v1462_v2  ;;  %940 = vmatprep.mubr.bf16.mxu1 %v1462_v2 }
  0x85   : > { %888 = vmatmul.mubr.bf16.gmra.mrb[4].mxu0 %v1464_v3  ;;  %941 = vmatmul.mubr.bf16.gmra.mrb[4].mxu1 %v1464_v3 }
 0x150   : > { %v879_v15 = vpop.f32.mrb[0].mxu0  ;;  %v932_v16 = vpop.f32.mrb[0].mxu1 }
 0x151   : > { %v1024_v17 = vadd.f32 %v1007_v11, %v879_v15  ;;  %v1026_v18 = vadd.f32 %v1015_v12, %v932_v16  ;;  %v881_v19 = vpop.f32.mrb[1].mxu0  ;;  %v934_v20 = vpop.f32.mrb[1].mxu1 }
 0x152   : > { %v1025_v21 = vadd.f32 %v1011_v13, %v881_v19  ;;  %v1027_v22 = vadd.f32 %v1019_v14, %v934_v20  ;;  %v883_v23 = vpop.f32.mrb[2].mxu0  ;;  %v936_v24 = vpop.f32.mrb[2].mxu1 }
 0x153   : > { %v1040_v25 = vmax.f32 %v1024_v17, 0.0  ;;  %v1042_v26 = vmax.f32 %v1026_v18, 0.0  ;;  %v1028_v27 = vadd.f32 %v1007_v11, %v883_v23  ;;  %v1030_v28 = vadd.f32 %v1015_v12, %v936_v24  ;;  %v885_v29 = vpop.f32.mrb[3].mxu0  ;;  %v938_v30 = vpop.f32.mrb[3].mxu1 }
 0x154   : > { %v1041_v31 = vmax.f32 %v1025_v21, 0.0  ;;  %v1043_v32 = vmax.f32 %v1027_v22, 0.0  ;;  %v1029_v33 = vadd.f32 %v1011_v13, %v885_v29  ;;  %v1031_v34 = vadd.f32 %v1019_v14, %v938_v30 }
 0x155   : > { %1056 = vst [vmem:[%s1794_s12] sm:$0xff] %v1040_v25  ;;  %1058 = vst [vmem:[%s1794_s12 + $0x10] sm:$0xff] %v1042_v26  ;;  %v1044_v35 = vmax.f32 %v1028_v27, 0.0  ;;  %v1046_v36 = vmax.f32 %v1030_v28, 0.0 }
 0x156   : > { %1057 = vst [vmem:[%s1794_s12 + $0x8] sm:$0xff] %v1041_v31  ;;  %1059 = vst [vmem:[%s1794_s12 + $0x18] sm:$0xff] %v1043_v32  ;;  %v1045_v37 = vmax.f32 %v1029_v33, 0.0  ;;  %v1047_v38 = vmax.f32 %v1031_v34, 0.0 }
 0x157   : > { %1060 = vst [vmem:[%s1794_s12 + $0x20] sm:$0xff] %v1044_v35  ;;  %1062 = vst [vmem:[%s1794_s12 + $0x30] sm:$0xff] %v1046_v36 }
 0x158   : > { %1061 = vst [vmem:[%s1794_s12 + $0x28] sm:$0xff] %v1045_v37  ;;  %1063 = vst [vmem:[%s1794_s12 + $0x38] sm:$0xff] %v1047_v38  ;;  %v889_v39 = vpop.f32.mrb[4].mxu0  ;;  %v942_v40 = vpop.f32.mrb[4].mxu1 }
 0x159   : > { %v1032_v41 = vadd.f32 %v1007_v11, %v889_v39  ;;  %v1034_v42 = vadd.f32 %v1015_v12, %v942_v40  ;;  %v891_v43 = vpop.f32.mrb[5].mxu0  ;;  %v944_v44 = vpop.f32.mrb[5].mxu1 }
 0x15a   : > { %v1033_v45 = vadd.f32 %v1011_v13, %v891_v43  ;;  %v1035_v46 = vadd.f32 %v1019_v14, %v944_v44  ;;  %v893_v47 = vpop.f32.mrb[6].mxu0  ;;  %v946_v48 = vpop.f32.mrb[6].mxu1  ;;  %1078 = sbr.rel (!%p1560_p6) target bundleno = 361 (0x169), region = 67 }
 0x15b   : > { %v1048_v49 = vmax.f32 %v1032_v41, 0.0  ;;  %v1050_v50 = vmax.f32 %v1034_v42, 0.0  ;;  %v1036_v51 = vadd.f32 %v1007_v11, %v893_v47  ;;  %v1038_v52 = vadd.f32 %v1015_v12, %v946_v48  ;;  %v895_v53 = vpop.f32.mrb[7].mxu0  ;;  %v948_v54 = vpop.f32.mrb[7].mxu1 }
 0x15c   : > { %v1049_v55 = vmax.f32 %v1033_v45, 0.0  ;;  %v1051_v56 = vmax.f32 %v1035_v46, 0.0  ;;  %v1037_v57 = vadd.f32 %v1011_v13, %v895_v53  ;;  %v1039_v58 = vadd.f32 %v1019_v14, %v948_v54  ;;  %v1097_v63 = vld [vmem:[%s1794_s12] sm:$0xff] (%p1560_p6)  ;;  %v1101_v1 = vld [vmem:[%s1794_s12 + $0x10] sm:$0xff] (%p1560_p6) }
 0x15d   : > { %1064 = vst [vmem:[%s1794_s12 + $0x40] sm:$0xff] %v1048_v49  ;;  %1066 = vst [vmem:[%s1794_s12 + $0x50] sm:$0xff] %v1050_v50  ;;  %v1052_v59 = vmax.f32 %v1036_v51, 0.0  ;;  %v1054_v60 = vmax.f32 %v1038_v52, 0.0  ;;  %v1099_v0 = vld [vmem:[%s1794_s12 + $0x8] sm:$0xff] (%p1560_p6)  ;;  %v1103_v2 = vld [vmem:[%s1794_s12 + $0x18] sm:$0xff] (%p1560_p6) }
 0x15e   : > { %1065 = vst [vmem:[%s1794_s12 + $0x48] sm:$0xff] %v1049_v55  ;;  %1067 = vst [vmem:[%s1794_s12 + $0x58] sm:$0xff] %v1051_v56  ;;  %v1053_v61 = vmax.f32 %v1037_v57, 0.0  ;;  %v1055_v62 = vmax.f32 %v1039_v58, 0.0  ;;  %v1105_v3 = vld [vmem:[%s1794_s12 + $0x20] sm:$0xff] (%p1560_p6)  ;;  %v1109_v5 = vld [vmem:[%s1794_s12 + $0x30] sm:$0xff] (%p1560_p6) }
 0x15f   : > { %1068 = vst [vmem:[%s1794_s12 + $0x60] sm:$0xff] %v1052_v59  ;;  %1070 = vst [vmem:[%s1794_s12 + $0x70] sm:$0xff] %v1054_v60  ;;  %v1107_v4 = vld [vmem:[%s1794_s12 + $0x28] sm:$0xff] (%p1560_p6)  ;;  %v1111_v6 = vld [vmem:[%s1794_s12 + $0x38] sm:$0xff] (%p1560_p6) }
 0x160   : > { %1069 = vst [vmem:[%s1794_s12 + $0x68] sm:$0xff] %v1053_v61  ;;  %1071 = vst [vmem:[%s1794_s12 + $0x78] sm:$0xff] %v1055_v62 }
 0x161   : > { %1098 = vst [vmem:[%s1084_s30] sm:$0xff] %v1097_v63  ;;  %1100 = vst [vmem:[%s1084_s30 + $0x8] sm:$0xff] %v1099_v0 }
 0x162   : > { %1102 = vst [vmem:[%s1084_s30 + $0x10] sm:$0xff] %v1101_v1  ;;  %1104 = vst [vmem:[%s1084_s30 + $0x18] sm:$0xff] %v1103_v2 }
 0x163   : > { %1106 = vst [vmem:[%s1084_s30 + $0x40] sm:$0xff] %v1105_v3  ;;  %1108 = vst [vmem:[%s1084_s30 + $0x48] sm:$0xff] %v1107_v4 }
 0x164   : > { %v1113_v7 = vld [vmem:[%s1794_s12 + $0x40] sm:$0xff]  ;;  %1110 = vst [vmem:[%s1084_s30 + $0x50] sm:$0xff] %v1109_v5  ;;  %1112 = vst [vmem:[%s1084_s30 + $0x58] sm:$0xff] %v1111_v6  ;;  %v1117_v9 = vld [vmem:[%s1794_s12 + $0x50] sm:$0xff] }
 0x165   : > { %1114 = vst [vmem:[%s1084_s30 + $0x80] sm:$0xff] %v1113_v7  ;;  %v1115_v8 = vld [vmem:[%s1794_s12 + $0x48] sm:$0xff]  ;;  %v1119_v10 = vld [vmem:[%s1794_s12 + $0x58] sm:$0xff]  ;;  %1118 = vst [vmem:[%s1084_s30 + $0x90] sm:$0xff] %v1117_v9 }
 0x166   : > { %1116 = vst [vmem:[%s1084_s30 + $0x88] sm:$0xff] %v1115_v8  ;;  %1120 = vst [vmem:[%s1084_s30 + $0x98] sm:$0xff] %v1119_v10  ;;  %v1121_v11 = vld [vmem:[%s1794_s12 + $0x60] sm:$0xff]  ;;  %v1125_v13 = vld [vmem:[%s1794_s12 + $0x70] sm:$0xff] }
 0x167   : > { %v1123_v12 = vld [vmem:[%s1794_s12 + $0x68] sm:$0xff]  ;;  %1122 = vst [vmem:[%s1084_s30 + $0xc0] sm:$0xff] %v1121_v11  ;;  %1126 = vst [vmem:[%s1084_s30 + $0xd0] sm:$0xff] %v1125_v13  ;;  %v1127_v14 = vld [vmem:[%s1794_s12 + $0x78] sm:$0xff] }
 0x168   : > { %1124 = vst [vmem:[%s1084_s30 + $0xc8] sm:$0xff] %v1123_v12  ;;  %1128 = vst [vmem:[%s1084_s30 + $0xd8] sm:$0xff] %v1127_v14 }
 0x169 PF: > { %s13_s16 = sadd.s32 1, %s1503_s16   ;;  %s1854_s12 = smov %s1491_s13 }
 0x16a   : > { %p10_p12 = scmp.ge.s32.totalorder %s13_s16, 4   ;;  %s1855_s13 = smov %s1565_s22 }
 0x16b   : > { %s1856_s14 = smov %s1499_s15  ;;  %s1857_s15 = smov %s1859_s17 }
 0x16c   :  { %12 = sbr.rel (!%p10_p12) target bundleno = 3 (0x3), region = 127 }

// kernel: saenet_forward.3
= control target key start
LH: loop header
LB: loop body
LE: loop exit
PB: predicated region body
PF: predicated region fallthrough
CT: control target
= control target key end

     0   :  { %11 = vsyncpa [#allocation7], 0  ;;  %s2054_s0 = inlined_call_operand.vmem [shape: bf16[32,1024], index: 0, kind: input, shape index: {}]   ;;  %s2055_s1 = inlined_call_operand.vmem [shape: bf16[32,1024], index: 1, kind: input, shape index: {}]   ;;  %s2056_s2 = inlined_call_operand.vmem [shape: bf16[1024,256], index: 2, kind: input, shape index: {}]   ;;  %s2057_s3 = inlined_call_operand.vmem [shape: f32[1,256], index: 3, kind: input, shape index: {}]   ;;  %s2058_s4 = inlined_call_operand.hbm [shape: f32[32,256], index: 4, kind: output, shape index: {0}]   ;;  %s2059_s5 = inlined_call_operand.hbm [shape: f32[32,256], index: 5, kind: output, shape index: {1}]  }
   0x1   :  { %12 = vsyncpa [#allocation9], 0  ;;  %s1834_s18 = smov 0   ;;  %s1836_s19 = smov 0  }
   0x2   :  { %s1838_s20 = smov 0   ;;  %s1840_s21 = smov 0  }
   0x3   :  { %s1842_s22 = smov 0  }
   0x4 LB: > { %s1399_s23 = sadd.s32 4294967295, %s1797_s22   ;;  %s30_s24 = sadd.s32 1, %s1793_s21  ;;  %s1797_s22 = sphi %s1842_s22, %s18_s22   ;;  %s1793_s21 = sphi %s1840_s21, %s2065_s21   ;;  %s1789_s20 = sphi %s1838_s20, %s2064_s20   ;;  %s1785_s19 = sphi %s1836_s19, %s2063_s19   ;;  %s1781_s18 = sphi %s1834_s18, %s2062_s18  }
   0x5   : > { %p31_p0 = scmp.ge.s32.totalorder %s30_s24, 2  ;;  %p53_p1 = scmp.ne.s32.totalorder %s1785_s19, %s1781_s18 }
   0x6   : > { %p54_p2 = scmp.eq.s32.totalorder %s1797_s22, 0  ;;  %s46_s27 = sadd.s32 1, %s1785_s19 }
   0x7   : > { %s2067_s24 = smov (%p31_p0, %s30_s24), 0  ;;  %p1402_p5 = scmp.ge.s32.totalorder %s1797_s22, 2 }
   0x8   : > { %p1866_p3 = por %p54_p2, %p53_p1  ;;  %s42_s26 = ssub.s32 %s1793_s21, %s2067_s24 }
   0x9   : > { %p44_p4 = scmp.eq.s32.totalorder %s42_s26, 0  ;;  %225 = sbr.rel (%p1402_p5) target bundleno = 32 (0x20), region = 20 }
   0xb   : > { %s1874_s28 = scalar_select %p44_p4, %s1785_s19, %s46_s27  }
  0x10   : > { %228 = sbr.rel (!%p1866_p3) target bundleno = 24 (0x18), region = 24  ;;  %s230_s29 = sand.u32 (%p1866_p3), 1, %s1785_s19  }
  0x11   : > { %s1503_s30 = sshll.u32 (%p1866_p3), %s1793_s21, 4  ;;  %s1403_s6 = sshll.u32 (%p1866_p3), %s230_s29, 6 }
  0x12   : > { %s238_s9 = scalar_lea.vmem (%p1866_p3), %s2054_s0, %s1503_s30  ;;  %s232_s10 = scalar_lea.vmem (%p1866_p3), [#allocation4], %s1403_s6 }
  0x13   : > { %v251_v0 = vld [vmem:[%s238_s9] sm:$0xff] (%p1866_p3)  ;;  %v253_v1 = vld [vmem:[%s238_s9 + $0x8] sm:$0xff] (%p1866_p3) }
  0x14   : > { %v255_v2 = vld [vmem:[%s238_s9 + $0x20] sm:$0xff] (%p1866_p3)  ;;  %252 = vst [vmem:[%s232_s10] sm:$0xff] (%p1866_p3), %v251_v0  ;;  %254 = vst [vmem:[%s232_s10 + $0x8] sm:$0xff] (%p1866_p3), %v253_v1  ;;  %v257_v3 = vld [vmem:[%s238_s9 + $0x28] sm:$0xff] (%p1866_p3) }
  0x15   : > { %256 = vst [vmem:[%s232_s10 + $0x10] sm:$0xff] (%p1866_p3), %v255_v2  ;;  %v259_v4 = vld [vmem:[%s238_s9 + $0x40] sm:$0xff] (%p1866_p3)  ;;  %v261_v5 = vld [vmem:[%s238_s9 + $0x48] sm:$0xff] (%p1866_p3)  ;;  %258 = vst [vmem:[%s232_s10 + $0x18] sm:$0xff] (%p1866_p3), %v257_v3 }
  0x16   : > { %260 = vst [vmem:[%s232_s10 + $0x20] sm:$0xff] (%p1866_p3), %v259_v4  ;;  %262 = vst [vmem:[%s232_s10 + $0x28] sm:$0xff] (%p1866_p3), %v261_v5  ;;  %v263_v6 = vld [vmem:[%s238_s9 + $0x60] sm:$0xff] (%p1866_p3)  ;;  %v265_v7 = vld [vmem:[%s238_s9 + $0x68] sm:$0xff] (%p1866_p3) }
  0x17   : > { %264 = vst [vmem:[%s232_s10 + $0x30] sm:$0xff] %v263_v6  ;;  %266 = vst [vmem:[%s232_s10 + $0x38] sm:$0xff] %v265_v7 }
  0x18 PF: > { %272 = sbr.rel (!%p1866_p3) target bundleno = 32 (0x20), region = 47  ;;  %s274_s11 = sand.u32 (%p1866_p3), 1, %s1785_s19  }
  0x19   : > { %s1504_s12 = sshll.u32 (%p1866_p3), %s1793_s21, 4  ;;  %s1406_s13 = sshll.u32 (%p1866_p3), %s274_s11, 6 }
  0x1a   : > { %s282_s16 = scalar_lea.vmem (%p1866_p3), %s2055_s1, %s1504_s12  ;;  %s276_s17 = scalar_lea.vmem (%p1866_p3), [#allocation5], %s1406_s13 }
  0x1b   : > { %v295_v8 = vld [vmem:[%s282_s16] sm:$0xff] (%p1866_p3)  ;;  %v297_v9 = vld [vmem:[%s282_s16 + $0x8] sm:$0xff] (%p1866_p3) }
  0x1c   : > { %v299_v10 = vld [vmem:[%s282_s16 + $0x20] sm:$0xff] (%p1866_p3)  ;;  %296 = vst [vmem:[%s276_s17] sm:$0xff] (%p1866_p3), %v295_v8  ;;  %298 = vst [vmem:[%s276_s17 + $0x8] sm:$0xff] (%p1866_p3), %v297_v9  ;;  %v301_v11 = vld [vmem:[%s282_s16 + $0x28] sm:$0xff] (%p1866_p3) }
  0x1d   : > { %300 = vst [vmem:[%s276_s17 + $0x10] sm:$0xff] (%p1866_p3), %v299_v10  ;;  %v303_v12 = vld [vmem:[%s282_s16 + $0x40] sm:$0xff] (%p1866_p3)  ;;  %v305_v13 = vld [vmem:[%s282_s16 + $0x48] sm:$0xff] (%p1866_p3)  ;;  %302 = vst [vmem:[%s276_s17 + $0x18] sm:$0xff] (%p1866_p3), %v301_v11 }
  0x1e   : > { %304 = vst [vmem:[%s276_s17 + $0x20] sm:$0xff] (%p1866_p3), %v303_v12  ;;  %306 = vst [vmem:[%s276_s17 + $0x28] sm:$0xff] (%p1866_p3), %v305_v13  ;;  %v307_v14 = vld [vmem:[%s282_s16 + $0x60] sm:$0xff] (%p1866_p3)  ;;  %v309_v15 = vld [vmem:[%s282_s16 + $0x68] sm:$0xff] (%p1866_p3) }
  0x1f   : > { %308 = vst [vmem:[%s276_s17 + $0x30] sm:$0xff] %v307_v14  ;;  %310 = vst [vmem:[%s276_s17 + $0x38] sm:$0xff] %v309_v15 }
  0x20 PF: > { %p1409_p6 = scmp.ge.s32.totalorder %s1797_s22, 1  ;;  %p330_p7 = scmp.lt.s32.totalorder %s1797_s22, 3 }
  0x22   : > { %p331_p8 = pnand %p1409_p6, %p330_p7 }
  0x23   : > { %s337_s25 = sand.u32 (!%p331_p8), 1, %s1781_s18   ;;  %s1412_s26 = sshll.u32 (!%p331_p8), %s1789_s20, 6 }
  0x24   : > { %334 = sbr.rel (%p331_p8) target bundleno = 470 (0x1d6), region = 74  ;;  %s1410_s27 = sshll.u32 (!%p331_p8), %s337_s25, 6 }
  0x25   : > { %p390_p9 = scmp.lt.s32.totalorder (!%p331_p8), %s1412_s26, 127  ;;  %s1900_s8 = scalar_lea.vmem (!%p331_p8), [#allocation4], %s1410_s27 }
  0x26   : > { %s1902_s9 = scalar_lea.vmem (!%p331_p8), [#allocation5], %s1410_s27  ;;  %p1415_p10 = scmp.ne.s32.totalorder (!%p331_p8), %s1789_s20, 0 }
  0x2b   : > { %s2069_s26 = smov (!%p390_p9, %s1412_s26), 127  ;;  %412 = sbr.rel (%p1415_p10) target bundleno = 53 (0x35), region = 86 }
  0x2c   : > { %s1505_s29 = sshll.u32 %s2069_s26, 3  ;;  %v1799_v16 = vmov (!%p1415_p10), 0.0  }
  0x2d   : > { %s1898_s7 = scalar_lea.vmem %s2056_s2, %s1505_s29  ;;  %413 = vst [vmem:[#allocation2] sm:$0xff] (!%p1415_p10), %v1799_v16  ;;  %414 = vst [vmem:[#allocation2 + $0x8] sm:$0xff] (!%p1415_p10), %v1799_v16 }
  0x2e   : > { %415 = vst [vmem:[#allocation2 + $0x10] sm:$0xff] (!%p1415_p10), %v1799_v16  ;;  %416 = vst [vmem:[#allocation2 + $0x18] sm:$0xff] (!%p1415_p10), %v1799_v16 }
  0x2f   : > { %417 = vst [vmem:[#allocation2 + $0x20] sm:$0xff] (!%p1415_p10), %v1799_v16  ;;  %418 = vst [vmem:[#allocation2 + $0x28] sm:$0xff] (!%p1415_p10), %v1799_v16 }
  0x30   : > { %419 = vst [vmem:[#allocation2 + $0x30] sm:$0xff] (!%p1415_p10), %v1799_v16  ;;  %420 = vst [vmem:[#allocation2 + $0x38] sm:$0xff] (!%p1415_p10), %v1799_v16 }
  0x31   : > { %421 = vst [vmem:[#allocation3] sm:$0xff] (!%p1415_p10), %v1799_v16  ;;  %422 = vst [vmem:[#allocation3 + $0x8] sm:$0xff] (!%p1415_p10), %v1799_v16 }
  0x32   : > { %423 = vst [vmem:[#allocation3 + $0x10] sm:$0xff] %v1799_v16  ;;  %424 = vst [vmem:[#allocation3 + $0x18] sm:$0xff] %v1799_v16 }
  0x33   : > { %425 = vst [vmem:[#allocation3 + $0x20] sm:$0xff] %v1799_v16  ;;  %426 = vst [vmem:[#allocation3 + $0x28] sm:$0xff] %v1799_v16 }
  0x34   : > { %427 = vst [vmem:[#allocation3 + $0x30] sm:$0xff] %v1799_v16  ;;  %428 = vst [vmem:[#allocation3 + $0x38] sm:$0xff] %v1799_v16 }
  0x35 PF: > { %v1579_v17 = vld [vmem:[%s1898_s7 + $0x4] ss:$8 sps:$4 sm:$0xff]   ;;  %v1581_v18 = vld [vmem:[%s1898_s7] ss:$8 sps:$4 sm:$0xff]   ;;  %v1582_v19 = vld [vmem:[%s1898_s7 + $0x14] ss:$8 sps:$4 sm:$0xff]  }
  0x36   : > { %869 = vmatprep.subr.bf16.mxu0 %v1579_v17  ;;  %1047 = vmatprep.subr.bf16.mxu1 %v1579_v17  ;;  %v1584_v20 = vld [vmem:[%s1898_s7 + $0x10] ss:$8 sps:$4 sm:$0xff]   ;;  %v1585_v21 = vld [vmem:[%s1898_s7 + $0x24] ss:$8 sps:$4 sm:$0xff]   ;;  %v1587_v22 = vld [vmem:[%s1898_s7 + $0x20] ss:$8 sps:$4 sm:$0xff]  }
  0x37   : > { %870 = vmatpush1.bf16.msra.mxu0 %v1581_v18  ;;  %1048 = vmatpush1.bf16.msra.mxu1 %v1581_v18  ;;  %v1588_v23 = vld [vmem:[%s1898_s7 + $0x34] ss:$8 sps:$4 sm:$0xff]   ;;  %v1590_v24 = vld [vmem:[%s1898_s7 + $0x30] ss:$8 sps:$4 sm:$0xff]   ;;  %v1591_v25 = vld [vmem:[%s1898_s7 + $0x44] ss:$8 sps:$4 sm:$0xff]  }
  0x38   : > { %871 = vmatprep.subr.bf16.mxu0 %v1582_v19  ;;  %1049 = vmatprep.subr.bf16.mxu1 %v1582_v19  ;;  %v1593_v26 = vld [vmem:[%s1898_s7 + $0x40] ss:$8 sps:$4 sm:$0xff]   ;;  %v1594_v27 = vld [vmem:[%s1898_s7 + $0x54] ss:$8 sps:$4 sm:$0xff]   ;;  %v1596_v28 = vld [vmem:[%s1898_s7 + $0x50] ss:$8 sps:$4 sm:$0xff]  }
  0x39   : > { %v1597_v29 = vld [vmem:[%s1898_s7 + $0x64] ss:$8 sps:$4 sm:$0xff]   ;;  %v1599_v31 = vld [vmem:[%s1898_s7 + $0x60] ss:$8 sps:$4 sm:$0xff]   ;;  %v1600_v32 = vld [vmem:[%s1898_s7 + $0x74] ss:$8 sps:$4 sm:$0xff]  }
  0x3a   : > { %v1629_v30 = vld [vmem:[%s1900_s8 + $0x4] ss:$16 sps:$4 sm:$0xff]   ;;  %v1602_v34 = vld [vmem:[%s1898_s7 + $0x70] ss:$8 sps:$4 sm:$0xff]   ;;  %v1605_v36 = vld [vmem:[%s1898_s7 + $0x80] ss:$8 sps:$4 sm:$0xff]  }
  0x3b   : > { %872 = vmatpush1.bf16.msra.mxu0 %v1584_v20  ;;  %1050 = vmatpush1.bf16.msra.mxu1 %v1584_v20  ;;  %v1635_v33 = vld [vmem:[%s1902_s9 + $0x4] ss:$16 sps:$4 sm:$0xff]   ;;  %v1608_v38 = vld [vmem:[%s1898_s7 + $0x90] ss:$8 sps:$4 sm:$0xff]   ;;  %v1611_v40 = vld [vmem:[%s1898_s7 + $0xa0] ss:$8 sps:$4 sm:$0xff]  }
  0x3c   : > { %873 = vmatprep.subr.bf16.mxu0 %v1585_v21  ;;  %1051 = vmatprep.subr.bf16.mxu1 %v1585_v21  ;;  %v1603_v35 = vld [vmem:[%s1898_s7 + $0x84] ss:$8 sps:$4 sm:$0xff]   ;;  %v1606_v37 = vld [vmem:[%s1898_s7 + $0x94] ss:$8 sps:$4 sm:$0xff]   ;;  %v1614_v42 = vld [vmem:[%s1898_s7 + $0xb0] ss:$8 sps:$4 sm:$0xff]  }
  0x3d   : > { %901 = vmatprep.mubr.bf16.mxu0 %v1629_v30  ;;  %1079 = vmatprep.mubr.bf16.mxu1 %v1635_v33  ;;  %v1609_v39 = vld [vmem:[%s1898_s7 + $0xa4] ss:$8 sps:$4 sm:$0xff]   ;;  %v1612_v41 = vld [vmem:[%s1898_s7 + $0xb4] ss:$8 sps:$4 sm:$0xff]   ;;  %v1617_v44 = vld [vmem:[%s1898_s7 + $0xc0] ss:$8 sps:$4 sm:$0xff]  }
  0x3e   : > { %v1615_v43 = vld [vmem:[%s1898_s7 + $0xc4] ss:$8 sps:$4 sm:$0xff]   ;;  %v1618_v45 = vld [vmem:[%s1898_s7 + $0xd4] ss:$8 sps:$4 sm:$0xff]   ;;  %v1620_v46 = vld [vmem:[%s1898_s7 + $0xd0] ss:$8 sps:$4 sm:$0xff]  }
  0x3f   : > { %874 = vmatpush1.bf16.msra.mxu0 %v1587_v22  ;;  %1052 = vmatpush1.bf16.msra.mxu1 %v1587_v22  ;;  %v1621_v47 = vld [vmem:[%s1898_s7 + $0xe4] ss:$8 sps:$4 sm:$0xff]   ;;  %v1623_v48 = vld [vmem:[%s1898_s7 + $0xe0] ss:$8 sps:$4 sm:$0xff]   ;;  %v1624_v49 = vld [vmem:[%s1898_s7 + $0xf4] ss:$8 sps:$4 sm:$0xff]  }
  0x40   : > { %875 = vmatprep.subr.bf16.mxu0 %v1588_v23  ;;  %1053 = vmatprep.subr.bf16.mxu1 %v1588_v23  ;;  %v1626_v50 = vld [vmem:[%s1898_s7 + $0xf0] ss:$8 sps:$4 sm:$0xff]   ;;  %v1632_v51 = vld [vmem:[%s1898_s7 + $0x104] ss:$8 sps:$4 sm:$0xff]   ;;  %v1630_v54 = vld [vmem:[%s1898_s7 + $0x100] ss:$8 sps:$4 sm:$0xff]  }
  0x41   : > { %v1627_v52 = vld [vmem:[%s1900_s8] ss:$16 sps:$4 sm:$0xff]   ;;  %v1638_v55 = vld [vmem:[%s1898_s7 + $0x114] ss:$8 sps:$4 sm:$0xff]   ;;  %v1641_v59 = vld [vmem:[%s1898_s7 + $0x124] ss:$8 sps:$4 sm:$0xff]  }
  0x42   : > { %v1633_v53 = vld [vmem:[%s1902_s9] ss:$16 sps:$4 sm:$0xff]   ;;  %v1675_v56 = vld [vmem:[%s1900_s8 + $0x24] ss:$16 sps:$4 sm:$0xff]   ;;  %v1689_v0 = vld [vmem:[%s1900_s8 + $0xc] ss:$16 sps:$4 sm:$0xff]  }
  0x43   : > { %876 = vmatpush1.bf16.msra.mxu0 %v1590_v24  ;;  %1054 = vmatpush1.bf16.msra.mxu1 %v1590_v24  ;;  %v1677_v57 = vld [vmem:[%s1902_s9 + $0x24] ss:$16 sps:$4 sm:$0xff]   ;;  %v1636_v58 = vld [vmem:[%s1898_s7 + $0x110] ss:$8 sps:$4 sm:$0xff]   ;;  %v1639_v62 = vld [vmem:[%s1898_s7 + $0x120] ss:$8 sps:$4 sm:$0xff]  }
  0x44   : > { %877 = vmatprep.subr.bf16.mxu0 %v1591_v25  ;;  %1055 = vmatprep.subr.bf16.mxu1 %v1591_v25  ;;  %v1679_v60 = vld [vmem:[%s1900_s8 + $0x20] ss:$16 sps:$4 sm:$0xff]   ;;  %v1644_v63 = vld [vmem:[%s1898_s7 + $0x134] ss:$8 sps:$4 sm:$0xff]   ;;  %v1647_v3 = vld [vmem:[%s1898_s7 + $0x144] ss:$8 sps:$4 sm:$0xff]  }
  0x45   : > { %v1683_v61 = vld [vmem:[%s1902_s9 + $0x20] ss:$16 sps:$4 sm:$0xff]   ;;  %v1692_v1 = vld [vmem:[%s1902_s9 + $0xc] ss:$16 sps:$4 sm:$0xff]   ;;  %p1496_p11 = scmp.ne.s32.totalorder %s1789_s20, 1 }
  0x46   : > { %v1642_v2 = vld [vmem:[%s1898_s7 + $0x130] ss:$8 sps:$4 sm:$0xff]   ;;  %v1645_v4 = vld [vmem:[%s1898_s7 + $0x140] ss:$8 sps:$4 sm:$0xff]   ;;  %v1650_v5 = vld [vmem:[%s1898_s7 + $0x154] ss:$8 sps:$4 sm:$0xff]  }
  0x47   : > { %878 = vmatpush1.bf16.msra.mxu0 %v1593_v26  ;;  %1056 = vmatpush1.bf16.msra.mxu1 %v1593_v26  ;;  %v1648_v6 = vld [vmem:[%s1898_s7 + $0x150] ss:$8 sps:$4 sm:$0xff]   ;;  %v1653_v7 = vld [vmem:[%s1898_s7 + $0x164] ss:$8 sps:$4 sm:$0xff]   ;;  %v1651_v8 = vld [vmem:[%s1898_s7 + $0x160] ss:$8 sps:$4 sm:$0xff]  }
  0x48   : > { %879 = vmatprep.subr.bf16.mxu0 %v1594_v27  ;;  %1057 = vmatprep.subr.bf16.mxu1 %v1594_v27  ;;  %v1656_v9 = vld [vmem:[%s1898_s7 + $0x174] ss:$8 sps:$4 sm:$0xff]   ;;  %v1654_v10 = vld [vmem:[%s1898_s7 + $0x170] ss:$8 sps:$4 sm:$0xff]   ;;  %v1659_v11 = vld [vmem:[%s1898_s7 + $0x184] ss:$8 sps:$4 sm:$0xff]  }
  0x49   : > { %v1657_v12 = vld [vmem:[%s1898_s7 + $0x180] ss:$8 sps:$4 sm:$0xff]   ;;  %v1662_v13 = vld [vmem:[%s1898_s7 + $0x194] ss:$8 sps:$4 sm:$0xff]   ;;  %v1660_v14 = vld [vmem:[%s1898_s7 + $0x190] ss:$8 sps:$4 sm:$0xff]  }
  0x4a   : > { %v1665_v15 = vld [vmem:[%s1898_s7 + $0x1a4] ss:$8 sps:$4 sm:$0xff]   ;;  %v1663_v16 = vld [vmem:[%s1898_s7 + $0x1a0] ss:$8 sps:$4 sm:$0xff]   ;;  %v1668_v17 = vld [vmem:[%s1898_s7 + $0x1b4] ss:$8 sps:$4 sm:$0xff]  }
  0x4b   : > { %880 = vmatpush1.bf16.msra.mxu0 %v1596_v28  ;;  %1058 = vmatpush1.bf16.msra.mxu1 %v1596_v28  ;;  %v1666_v18 = vld [vmem:[%s1898_s7 + $0x1b0] ss:$8 sps:$4 sm:$0xff]   ;;  %v1671_v19 = vld [vmem:[%s1898_s7 + $0x1c4] ss:$8 sps:$4 sm:$0xff]   ;;  %v1669_v20 = vld [vmem:[%s1898_s7 + $0x1c0] ss:$8 sps:$4 sm:$0xff]  }
  0x4c   : > { %881 = vmatprep.subr.bf16.mxu0 %v1597_v29  ;;  %1059 = vmatprep.subr.bf16.mxu1 %v1597_v29  ;;  %v1674_v21 = vld [vmem:[%s1898_s7 + $0x1d4] ss:$8 sps:$4 sm:$0xff]   ;;  %v1672_v22 = vld [vmem:[%s1898_s7 + $0x1d0] ss:$8 sps:$4 sm:$0xff]   ;;  %v1682_v23 = vld [vmem:[%s1898_s7 + $0x1e4] ss:$8 sps:$4 sm:$0xff]  }
  0x4d   : > { %v1680_v24 = vld [vmem:[%s1898_s7 + $0x1e0] ss:$8 sps:$4 sm:$0xff]   ;;  %v1686_v25 = vld [vmem:[%s1898_s7 + $0x1f4] ss:$8 sps:$4 sm:$0xff]   ;;  %v1684_v26 = vld [vmem:[%s1898_s7 + $0x1f0] ss:$8 sps:$4 sm:$0xff]  }
  0x4e   : > { %v1687_v27 = vld [vmem:[%s1900_s8 + $0x8] ss:$16 sps:$4 sm:$0xff]   ;;  %v1693_v29 = vld [vmem:[%s1900_s8 + $0x2c] ss:$16 sps:$4 sm:$0xff]   ;;  %v493_v33 = vld [vmem:[#allocation2] sm:$0xff] }
  0x4f   : > { %882 = vmatpush1.bf16.msra.mxu0 %v1599_v31  ;;  %1060 = vmatpush1.bf16.msra.mxu1 %v1599_v31  ;;  %v1690_v28 = vld [vmem:[%s1902_s9 + $0x8] ss:$16 sps:$4 sm:$0xff]   ;;  %v1695_v30 = vld [vmem:[%s1902_s9 + $0x2c] ss:$16 sps:$4 sm:$0xff]  }
  0x50   : > { %883 = vmatprep.subr.bf16.mxu0 %v1600_v32  ;;  %1061 = vmatprep.subr.bf16.mxu1 %v1600_v32  ;;  %v1697_v31 = vld [vmem:[%s1900_s8 + $0x28] ss:$16 sps:$4 sm:$0xff]  }
  0x51   : > { %v1698_v32 = vld [vmem:[%s1902_s9 + $0x28] ss:$16 sps:$4 sm:$0xff]  }
  0x53   : > { %884 = vmatpush1.bf16.msra.mxu0 %v1602_v34  ;;  %1062 = vmatpush1.bf16.msra.mxu1 %v1602_v34  ;;  %v991_v34 = vld [vmem:[#allocation3] sm:$0xff] }
  0x54   : > { %885 = vmatprep.subr.bf16.mxu0 %v1603_v35  ;;  %1063 = vmatprep.subr.bf16.mxu1 %v1603_v35  ;;  %v494_v35 = vld [vmem:[#allocation2 + $0x8] sm:$0xff] }
  0x57   : > { %886 = vmatpush1.bf16.msra.mxu0 %v1605_v36  ;;  %1064 = vmatpush1.bf16.msra.mxu1 %v1605_v36  ;;  %v992_v36 = vld [vmem:[#allocation3 + $0x8] sm:$0xff] }
  0x58   : > { %887 = vmatprep.subr.bf16.mxu0 %v1606_v37  ;;  %1065 = vmatprep.subr.bf16.mxu1 %v1606_v37 }
  0x5b   : > { %888 = vmatpush1.bf16.msra.mxu0 %v1608_v38  ;;  %1066 = vmatpush1.bf16.msra.mxu1 %v1608_v38 }
  0x5c   : > { %889 = vmatprep.subr.bf16.mxu0 %v1609_v39  ;;  %1067 = vmatprep.subr.bf16.mxu1 %v1609_v39  ;;  %v495_v39 = vld [vmem:[#allocation2 + $0x10] sm:$0xff] }
  0x5f   : > { %890 = vmatpush1.bf16.msra.mxu0 %v1611_v40  ;;  %1068 = vmatpush1.bf16.msra.mxu1 %v1611_v40  ;;  %v993_v40 = vld [vmem:[#allocation3 + $0x10] sm:$0xff] }
  0x60   : > { %891 = vmatprep.subr.bf16.mxu0 %v1612_v41  ;;  %1069 = vmatprep.subr.bf16.mxu1 %v1612_v41 }
  0x63   : > { %892 = vmatpush1.bf16.msra.mxu0 %v1614_v42  ;;  %1070 = vmatpush1.bf16.msra.mxu1 %v1614_v42 }
  0x64   : > { %893 = vmatprep.subr.bf16.mxu0 %v1615_v43  ;;  %1071 = vmatprep.subr.bf16.mxu1 %v1615_v43 }
  0x67   : > { %894 = vmatpush1.bf16.msra.mxu0 %v1617_v44  ;;  %1072 = vmatpush1.bf16.msra.mxu1 %v1617_v44 }
  0x68   : > { %895 = vmatprep.subr.bf16.mxu0 %v1618_v45  ;;  %1073 = vmatprep.subr.bf16.mxu1 %v1618_v45  ;;  %v496_v45 = vld [vmem:[#allocation2 + $0x18] sm:$0xff] }
  0x6b   : > { %896 = vmatpush1.bf16.msra.mxu0 %v1620_v46  ;;  %1074 = vmatpush1.bf16.msra.mxu1 %v1620_v46  ;;  %v994_v46 = vld [vmem:[#allocation3 + $0x18] sm:$0xff] }
  0x6c   : > { %897 = vmatprep.subr.bf16.mxu0 %v1621_v47  ;;  %1075 = vmatprep.subr.bf16.mxu1 %v1621_v47 }
  0x6f   : > { %898 = vmatpush1.bf16.msra.mxu0 %v1623_v48  ;;  %1076 = vmatpush1.bf16.msra.mxu1 %v1623_v48 }
  0x70   : > { %899 = vmatprep.subr.bf16.mxu0 %v1624_v49  ;;  %1077 = vmatprep.subr.bf16.mxu1 %v1624_v49 }
  0x73   : > { %900 = vmatpush1.bf16.msra.mxu0 %v1626_v50  ;;  %1078 = vmatpush1.bf16.msra.mxu1 %v1626_v50 }
  0x74   : > { %922 = vmatprep.subr.bf16.mxu0 %v1632_v51  ;;  %1100 = vmatprep.subr.bf16.mxu1 %v1632_v51 }
  0x76   : > { %902 = vmatmul.mubr.bf16.vlgmr.msra.gmra.mrb[0].mxu0 %v1627_v52  ;;  %1080 = vmatmul.mubr.bf16.vlgmr.msra.gmra.mrb[0].mxu1 %v1633_v53 }
  0x77   : > { %923 = vmatpush1.bf16.msra.mxu0 %v1630_v54  ;;  %1101 = vmatpush1.bf16.msra.mxu1 %v1630_v54 }
  0x78   : > { %924 = vmatprep.subr.bf16.mxu0 %v1638_v55  ;;  %1102 = vmatprep.subr.bf16.mxu1 %v1638_v55 }
  0x79   : > { %911 = vmatprep.mubr.bf16.mxu0 %v1675_v56  ;;  %1089 = vmatprep.mubr.bf16.mxu1 %v1677_v57  ;;  %v497_v57 = vld [vmem:[#allocation2 + $0x20] sm:$0xff] }
  0x7b   : > { %925 = vmatpush1.bf16.msra.mxu0 %v1636_v58  ;;  %1103 = vmatpush1.bf16.msra.mxu1 %v1636_v58  ;;  %v995_v58 = vld [vmem:[#allocation3 + $0x20] sm:$0xff] }
  0x7c   : > { %926 = vmatprep.subr.bf16.mxu0 %v1641_v59  ;;  %1104 = vmatprep.subr.bf16.mxu1 %v1641_v59  ;;  %v498_v59 = vld [vmem:[#allocation2 + $0x28] sm:$0xff] }
  0x7e   : > { %912 = vmatmul.mubr.bf16.gmra.mrb[4].mxu0 %v1679_v60  ;;  %1090 = vmatmul.mubr.bf16.gmra.mrb[4].mxu1 %v1683_v61  ;;  %v996_v60 = vld [vmem:[#allocation3 + $0x28] sm:$0xff] }
  0x7f   : > { %927 = vmatpush1.bf16.msra.mxu0 %v1639_v62  ;;  %1105 = vmatpush1.bf16.msra.mxu1 %v1639_v62 }
  0x80   : > { %928 = vmatprep.subr.bf16.mxu0 %v1644_v63  ;;  %1106 = vmatprep.subr.bf16.mxu1 %v1644_v63  ;;  %v499_v63 = vld [vmem:[#allocation2 + $0x30] sm:$0xff] }
  0x81   : > { %954 = vmatprep.mubr.bf16.mxu0 %v1689_v0  ;;  %1132 = vmatprep.mubr.bf16.mxu1 %v1692_v1  ;;  %v997_v0 = vld [vmem:[#allocation3 + $0x30] sm:$0xff] }
  0x83   : > { %929 = vmatpush1.bf16.msra.mxu0 %v1642_v2  ;;  %1107 = vmatpush1.bf16.msra.mxu1 %v1642_v2 }
  0x84   : > { %930 = vmatprep.subr.bf16.mxu0 %v1647_v3  ;;  %1108 = vmatprep.subr.bf16.mxu1 %v1647_v3 }
  0x87   : > { %931 = vmatpush1.bf16.msra.mxu0 %v1645_v4  ;;  %1109 = vmatpush1.bf16.msra.mxu1 %v1645_v4 }
  0x88   : > { %932 = vmatprep.subr.bf16.mxu0 %v1650_v5  ;;  %1110 = vmatprep.subr.bf16.mxu1 %v1650_v5  ;;  %v500_v5 = vld [vmem:[#allocation2 + $0x38] sm:$0xff] }
  0x8b   : > { %933 = vmatpush1.bf16.msra.mxu0 %v1648_v6  ;;  %1111 = vmatpush1.bf16.msra.mxu1 %v1648_v6  ;;  %v998_v6 = vld [vmem:[#allocation3 + $0x38] sm:$0xff] }
  0x8c   : > { %934 = vmatprep.subr.bf16.mxu0 %v1653_v7  ;;  %1112 = vmatprep.subr.bf16.mxu1 %v1653_v7 }
  0x8f   : > { %935 = vmatpush1.bf16.msra.mxu0 %v1651_v8  ;;  %1113 = vmatpush1.bf16.msra.mxu1 %v1651_v8 }
  0x90   : > { %936 = vmatprep.subr.bf16.mxu0 %v1656_v9  ;;  %1114 = vmatprep.subr.bf16.mxu1 %v1656_v9 }
  0x93   : > { %937 = vmatpush1.bf16.msra.mxu0 %v1654_v10  ;;  %1115 = vmatpush1.bf16.msra.mxu1 %v1654_v10 }
  0x94   : > { %938 = vmatprep.subr.bf16.mxu0 %v1659_v11  ;;  %1116 = vmatprep.subr.bf16.mxu1 %v1659_v11 }
  0x97   : > { %939 = vmatpush1.bf16.msra.mxu0 %v1657_v12  ;;  %1117 = vmatpush1.bf16.msra.mxu1 %v1657_v12 }
  0x98   : > { %940 = vmatprep.subr.bf16.mxu0 %v1662_v13  ;;  %1118 = vmatprep.subr.bf16.mxu1 %v1662_v13 }
  0x9b   : > { %941 = vmatpush1.bf16.msra.mxu0 %v1660_v14  ;;  %1119 = vmatpush1.bf16.msra.mxu1 %v1660_v14 }
  0x9c   : > { %942 = vmatprep.subr.bf16.mxu0 %v1665_v15  ;;  %1120 = vmatprep.subr.bf16.mxu1 %v1665_v15 }
  0x9f   : > { %943 = vmatpush1.bf16.msra.mxu0 %v1663_v16  ;;  %1121 = vmatpush1.bf16.msra.mxu1 %v1663_v16 }
  0xa0   : > { %944 = vmatprep.subr.bf16.mxu0 %v1668_v17  ;;  %1122 = vmatprep.subr.bf16.mxu1 %v1668_v17  ;;  %v1183_v17 = vlaneseq (!%p1496_p11) }
  0xa3   : > { %945 = vmatpush1.bf16.msra.mxu0 %v1666_v18  ;;  %1123 = vmatpush1.bf16.msra.mxu1 %v1666_v18  ;;  %v1184_v18 = vshrl.u32 (!%p1496_p11), %v1183_v17, 7 }
  0xa4   : > { %946 = vmatprep.subr.bf16.mxu0 %v1671_v19  ;;  %1124 = vmatprep.subr.bf16.mxu1 %v1671_v19  ;;  %v1173_v19 = vld [vmem:[%s2057_s3] sm:$0x3] (!%p1496_p11) }
  0xa7   : > { %947 = vmatpush1.bf16.msra.mxu0 %v1669_v20  ;;  %1125 = vmatpush1.bf16.msra.mxu1 %v1669_v20 }
  0xa8   : > { %948 = vmatprep.subr.bf16.mxu0 %v1674_v21  ;;  %1126 = vmatprep.subr.bf16.mxu1 %v1674_v21  ;;  %v1185_v21 = vsub.s32 (!%p1496_p11), 0, %v1184_v18 }
  0xab   : > { %949 = vmatpush1.bf16.msra.mxu0 %v1672_v22  ;;  %1127 = vmatpush1.bf16.msra.mxu1 %v1672_v22 }
  0xac   : > { %950 = vmatprep.subr.bf16.mxu0 %v1682_v23  ;;  %1128 = vmatprep.subr.bf16.mxu1 %v1682_v23  ;;  %v1189_v23 = vsub.s32 (!%p1496_p11), 1, %v1184_v18 }
  0xaf   : > { %951 = vmatpush1.bf16.msra.mxu0 %v1680_v24  ;;  %1129 = vmatpush1.bf16.msra.mxu1 %v1680_v24 }
  0xb0   : > { %952 = vmatprep.subr.bf16.mxu0 %v1686_v25  ;;  %1130 = vmatprep.subr.bf16.mxu1 %v1686_v25 }
  0xb3   : > { %953 = vmatpush1.bf16.msra.mxu0 %v1684_v26  ;;  %1131 = vmatpush1.bf16.msra.mxu1 %v1684_v26 }
  0xb6   : > { %955 = vmatmul.mubr.bf16.vlgmr.msra.gmra.mrb[0].mxu0 %v1687_v27  ;;  %1133 = vmatmul.mubr.bf16.vlgmr.msra.gmra.mrb[0].mxu1 %v1690_v28 }
  0xb7   : > { %964 = vmatprep.mubr.bf16.mxu0 %v1693_v29  ;;  %1142 = vmatprep.mubr.bf16.mxu1 %v1695_v30  ;;  %v1186_v29 = vrot.slane (!%p1496_p11), %v1173_v19, %v1185_v21  ;;  %v1190_v30 = vrot.slane (!%p1496_p11), %v1173_v19, %v1189_v23 }
  0xbe   : > { %965 = vmatmul.mubr.bf16.gmra.mrb[4].mxu0 %v1697_v31  ;;  %1143 = vmatmul.mubr.bf16.gmra.mrb[4].mxu1 %v1698_v32 }
 0x189   : > { %v956_v37 = vpop.f32.mrb[0].mxu0  ;;  %v1134_v38 = vpop.f32.mrb[0].mxu1 }
 0x18a   : > { %v975_v41 = vadd.f32 %v956_v37, %v493_v33  ;;  %v1153_v42 = vadd.f32 %v1134_v38, %v991_v34  ;;  %v958_v43 = vpop.f32.mrb[1].mxu0  ;;  %v1136_v44 = vpop.f32.mrb[1].mxu1 }
 0x18b   : > { %v976_v47 = vadd.f32 %v958_v43, %v494_v35  ;;  %v1154_v48 = vadd.f32 %v1136_v44, %v992_v36  ;;  %v960_v49 = vpop.f32.mrb[2].mxu0  ;;  %v1138_v50 = vpop.f32.mrb[2].mxu1 }
 0x18c   : > { %983 = vst [vmem:[#allocation2] sm:$0xff] %v975_v41  ;;  %1161 = vst [vmem:[#allocation3] sm:$0xff] %v1153_v42  ;;  %v977_v51 = vadd.f32 %v960_v49, %v495_v39  ;;  %v1155_v52 = vadd.f32 %v1138_v50, %v993_v40  ;;  %v962_v53 = vpop.f32.mrb[3].mxu0  ;;  %v1140_v54 = vpop.f32.mrb[3].mxu1 }
 0x18d   : > { %984 = vst [vmem:[#allocation2 + $0x8] sm:$0xff] %v976_v47  ;;  %1162 = vst [vmem:[#allocation3 + $0x8] sm:$0xff] %v1154_v48  ;;  %v978_v55 = vadd.f32 %v962_v53, %v496_v45  ;;  %v1156_v56 = vadd.f32 %v1140_v54, %v994_v46 }
 0x18e   : > { %985 = vst [vmem:[#allocation2 + $0x10] sm:$0xff] %v977_v51  ;;  %1163 = vst [vmem:[#allocation3 + $0x10] sm:$0xff] %v1155_v52 }
 0x18f   : > { %986 = vst [vmem:[#allocation2 + $0x18] sm:$0xff] %v978_v55  ;;  %1164 = vst [vmem:[#allocation3 + $0x18] sm:$0xff] %v1156_v56 }
 0x191   : > { %v966_v61 = vpop.f32.mrb[4].mxu0  ;;  %v1144_v62 = vpop.f32.mrb[4].mxu1  ;;  %1172 = sbr.rel (%p1496_p11) target bundleno = 419 (0x1a3), region = 90 }
 0x192   : > { %v979_v1 = vadd.f32 %v966_v61, %v497_v57  ;;  %v1157_v2 = vadd.f32 %v1144_v62, %v995_v58  ;;  %v968_v3 = vpop.f32.mrb[5].mxu0  ;;  %v1146_v4 = vpop.f32.mrb[5].mxu1 }
 0x193   : > { %v980_v7 = vadd.f32 %v968_v3, %v498_v59  ;;  %v1158_v8 = vadd.f32 %v1146_v4, %v996_v60  ;;  %v970_v9 = vpop.f32.mrb[6].mxu0  ;;  %v1148_v10 = vpop.f32.mrb[6].mxu1  ;;  %v1174_v20 = vld [vmem:[#allocation2] sm:$0xff] (!%p1496_p11) }
 0x194   : > { %987 = vst [vmem:[#allocation2 + $0x20] sm:$0xff] %v979_v1  ;;  %1165 = vst [vmem:[#allocation3 + $0x20] sm:$0xff] %v1157_v2  ;;  %v981_v11 = vadd.f32 %v970_v9, %v499_v63  ;;  %v1159_v12 = vadd.f32 %v1148_v10, %v997_v0  ;;  %v972_v13 = vpop.f32.mrb[7].mxu0  ;;  %v1150_v14 = vpop.f32.mrb[7].mxu1  ;;  %v1175_v22 = vld [vmem:[#allocation2 + $0x8] sm:$0xff] (!%p1496_p11)  ;;  %v1209_v32 = vld [vmem:[#allocation3] sm:$0xff] (!%p1496_p11)  ;;  %v1193_v37 = vadd.f32 (!%p1496_p11), %v1186_v29, %v1174_v20 }
 0x195   : > { %988 = vst [vmem:[#allocation2 + $0x28] sm:$0xff] %v980_v7  ;;  %1166 = vst [vmem:[#allocation3 + $0x28] sm:$0xff] %v1158_v8  ;;  %v982_v15 = vadd.f32 %v972_v13, %v500_v5  ;;  %v1160_v16 = vadd.f32 %v1150_v14, %v998_v6  ;;  %v1176_v24 = vld [vmem:[#allocation2 + $0x10] sm:$0xff] (!%p1496_p11)  ;;  %v1210_v33 = vld [vmem:[#allocation3 + $0x8] sm:$0xff] (!%p1496_p11)  ;;  %v1194_v38 = vadd.f32 (!%p1496_p11), %v1190_v30, %v1175_v22 }
 0x196   : > { %989 = vst [vmem:[#allocation2 + $0x30] sm:$0xff] %v981_v11  ;;  %1167 = vst [vmem:[#allocation3 + $0x30] sm:$0xff] %v1159_v12  ;;  %v1177_v25 = vld [vmem:[#allocation2 + $0x18] sm:$0xff] (!%p1496_p11)  ;;  %v1211_v34 = vld [vmem:[#allocation3 + $0x10] sm:$0xff] (!%p1496_p11)  ;;  %v1195_v39 = vadd.f32 (!%p1496_p11), %v1186_v29, %v1176_v24  ;;  %v1217_v48 = vadd.f32 (!%p1496_p11), %v1209_v32, %v1186_v29  ;;  %v1218_v49 = vadd.f32 (!%p1496_p11), %v1210_v33, %v1190_v30 }
 0x197   : > { %990 = vst [vmem:[#allocation2 + $0x38] sm:$0xff] %v982_v15  ;;  %1168 = vst [vmem:[#allocation3 + $0x38] sm:$0xff] %v1160_v16  ;;  %v1212_v35 = vld [vmem:[#allocation3 + $0x18] sm:$0xff] (!%p1496_p11)  ;;  %v1196_v40 = vadd.f32 (!%p1496_p11), %v1190_v30, %v1177_v25  ;;  %v1219_v50 = vadd.f32 (!%p1496_p11), %v1211_v34, %v1186_v29 }
 0x198   : > { %1201 = vst [vmem:[#allocation6] sm:$0xff] %v1193_v37  ;;  %1202 = vst [vmem:[#allocation6 + $0x8] sm:$0xff] %v1194_v38  ;;  %v1220_v51 = vadd.f32 %v1212_v35, %v1190_v30 }
 0x199   : > { %1203 = vst [vmem:[#allocation6 + $0x10] sm:$0xff] %v1195_v39  ;;  %1204 = vst [vmem:[#allocation6 + $0x18] sm:$0xff] %v1196_v40 }
 0x19a   : > { %1225 = vst [vmem:[#allocation8] sm:$0xff] %v1217_v48  ;;  %1226 = vst [vmem:[#allocation8 + $0x8] sm:$0xff] %v1218_v49 }
 0x19b   : > { %v1178_v26 = vld [vmem:[#allocation2 + $0x20] sm:$0xff]  ;;  %1227 = vst [vmem:[#allocation8 + $0x10] sm:$0xff] %v1219_v50  ;;  %1228 = vst [vmem:[#allocation8 + $0x18] sm:$0xff] %v1220_v51 }
 0x19c   : > { %v1179_v27 = vld [vmem:[#allocation2 + $0x28] sm:$0xff]  ;;  %v1213_v36 = vld [vmem:[#allocation3 + $0x20] sm:$0xff]  ;;  %v1197_v44 = vadd.f32 %v1186_v29, %v1178_v26 }
 0x19d   : > { %v1180_v28 = vld [vmem:[#allocation2 + $0x30] sm:$0xff]  ;;  %v1214_v41 = vld [vmem:[#allocation3 + $0x28] sm:$0xff]  ;;  %v1198_v45 = vadd.f32 %v1190_v30, %v1179_v27  ;;  %v1221_v52 = vadd.f32 %v1213_v36, %v1186_v29 }
 0x19e   : > { %v1181_v31 = vld [vmem:[#allocation2 + $0x38] sm:$0xff]  ;;  %v1215_v42 = vld [vmem:[#allocation3 + $0x30] sm:$0xff]  ;;  %v1199_v46 = vadd.f32 %v1186_v29, %v1180_v28  ;;  %1205 = vst [vmem:[#allocation6 + $0x20] sm:$0xff] %v1197_v44  ;;  %v1222_v53 = vadd.f32 %v1214_v41, %v1190_v30 }
 0x19f   : > { %v1216_v43 = vld [vmem:[#allocation3 + $0x38] sm:$0xff]  ;;  %v1200_v47 = vadd.f32 %v1190_v30, %v1181_v31  ;;  %1206 = vst [vmem:[#allocation6 + $0x28] sm:$0xff] %v1198_v45  ;;  %v1223_v54 = vadd.f32 %v1215_v42, %v1186_v29  ;;  %1229 = vst [vmem:[#allocation8 + $0x20] sm:$0xff] %v1221_v52 }
 0x1a0   : > { %1207 = vst [vmem:[#allocation6 + $0x30] sm:$0xff] %v1199_v46  ;;  %v1224_v55 = vadd.f32 %v1216_v43, %v1190_v30  ;;  %1230 = vst [vmem:[#allocation8 + $0x28] sm:$0xff] %v1222_v53 }
 0x1a1   : > { %1208 = vst [vmem:[#allocation6 + $0x38] sm:$0xff] %v1200_v47  ;;  %1231 = vst [vmem:[#allocation8 + $0x30] sm:$0xff] %v1223_v54 }
 0x1a2   : > { %1232 = vst [vmem:[#allocation8 + $0x38] sm:$0xff] %v1224_v55 }
 0x1a3 PF: > { %p1991_p12 = scmp.eq.s32.totalorder %s1399_s23, 1  ;;  %s1800_s11 = smov [#allocation6]  }
 0x1a4   : > { %s1245_s12 = sshll.u32 %s1800_s11, 4  ;;  %s1246_s12 = int_to_ptr.vmem [resolvable:$true] %s1245_s12 }
 0x1a5   : > { %s1699_s13 = scalar_lea.vmem %s1246_s12, 1024  ;;  %p1706_p2 = scmp.lt.s32.totalorder %s1246_s12, %s1246_s12 }
 0x1a6   : > { %p1700_p13 = scmp.ne.s32.totalorder %s1246_s12, %s1699_s13  ;;  %p1707_p3 = scmp.lt.s32.totalorder %s1699_s13, %s1699_s13 }
 0x1a8   : > { %p1701_p0 = pnand %p1700_p13, %p1991_p12  ;;  %p1708_p4 = por %p1707_p3, %p1706_p2 }
 0x1aa   : > { %p1702_p1 = pneg %p1701_p0 }
 0x1ac   : > { %p1709_p5 = pnand %p1708_p4, %p1702_p1 }
 0x1ae   : > { %1712 = shalt.err (!%p1709_p5)
}
 0x1af   : > { %s1713_s23 = scalar_lea.hbm %s2058_s4, 1024 }
 0x1b0   : > { %p1714_p6 = scmp.ne.s32.totalorder %s2058_s4, %s1713_s23  ;;  %p1719_p9 = scmp.lt.u32.totalorder %s1713_s23, %s2058_s4 }
 0x1b2   : > { %p1715_p7 = pnand %p1714_p6, %p1991_p12 }
 0x1b4   : > { %p1716_p8 = pneg %p1715_p7 }
 0x1b6   : > { %p1721_p10 = pnand %p1719_p9, %p1716_p8 }
 0x1b8   : > { %1724 = shalt.err (!%p1721_p10)
}
 0x1b9   : > { %s1801_s27 = smov 256   ;;  %s1802_s29 = smov 16  }
 0x1ba   : > { %1523 = dma.vmem_to_hbm [thread:$0]  (%p1991_p12), %s1246_s12, 1024, %s2058_s4, [#allocation7], %s1801_s27, %s1801_s27, %s1802_s29  }
 0x1bb   : > { %s1803_s7 = smov [#allocation8]  }
 0x1bc   : > { %s1264_s8 = sshll.u32 %s1803_s7, 4  ;;  %s1265_s8 = int_to_ptr.vmem [resolvable:$true] %s1264_s8 }
 0x1bd   : > { %s1725_s9 = scalar_lea.vmem %s1265_s8, 1024  ;;  %p1732_p1 = scmp.lt.s32.totalorder %s1265_s8, %s1265_s8 }
 0x1be   : > { %p1726_p11 = scmp.ne.s32.totalorder %s1265_s8, %s1725_s9  ;;  %p1733_p2 = scmp.lt.s32.totalorder %s1725_s9, %s1725_s9 }
 0x1c0   : > { %p1727_p13 = pnand %p1726_p11, %p1991_p12  ;;  %p1734_p3 = por %p1733_p2, %p1732_p1 }
 0x1c2   : > { %p1728_p0 = pneg %p1727_p13 }
 0x1c4   : > { %p1735_p4 = pnand %p1734_p3, %p1728_p0 }
 0x1c6   : > { %1738 = shalt.err (!%p1735_p4)
}
 0x1c7   : > { %s1739_s11 = scalar_lea.hbm %s2059_s5, 1024 }
 0x1c8   : > { %p1740_p5 = scmp.ne.s32.totalorder %s2059_s5, %s1739_s11  ;;  %p1745_p8 = scmp.lt.u32.totalorder %s1739_s11, %s2059_s5 }
 0x1ca   : > { %p1741_p6 = pnand %p1740_p5, %p1991_p12 }
 0x1cc   : > { %p1742_p7 = pneg %p1741_p6 }
 0x1ce   : > { %p1747_p9 = pnand %p1745_p8, %p1742_p7 }
 0x1d0   : > { %1750 = shalt.err (!%p1747_p9)
}
 0x1d1   : > { %1525 = dma.vmem_to_hbm [thread:$0]  (%p1991_p12), %s1265_s8, 1024, %s2059_s5, [#allocation9], %s1801_s27, %s1801_s27, %s1802_s29  }
 0x1d2   : > { %1772 = dma.done.wait (%p1991_p12), [#allocation7], 1024  }
 0x1d3   : > { %1774 = vsyncadd (%p1991_p12), [#allocation7], 4294966272 }
 0x1d4   : > { %1776 = dma.done.wait (%p1991_p12), [#allocation9], 1024  }
 0x1d5   : > { %1778 = vsyncadd (%p1991_p12), [#allocation9], 4294966272 }
 0x1d6 PF: > { %s18_s22 = sadd.s32 1, %s1797_s22   ;;  %s2062_s18 = smov %s1785_s19 }
 0x1d7   : > { %p15_p10 = scmp.ge.s32.totalorder %s18_s22, 4   ;;  %s2063_s19 = smov %s1874_s28 }
 0x1d8   : > { %s2064_s20 = smov %s1793_s21  ;;  %s2065_s21 = smov %s2067_s24 }
 0x1d9   :  { %17 = sbr.rel (!%p15_p10) target bundleno = 4 (0x4), region = 146 }
 0x1e0   :  { %1284 = vsyncpa [#allocation7], 1 }
 0x1e1   :  { %1286 = vsyncpa [#allocation7 + $0x1], 1 }
 0x1e2   :  { %1287 = vsyncpa [#allocation9], 1 }

</bundles_post_ra>
